<compile_context>
chip_gen: v5e
topology: v5e:2x2
jax: 0.10.0
libtpu: 0.0.40
codegen_flags: <defaults>
</compile_context>

<pallas_src>
import jax
import jax.numpy as jnp
from jax.experimental import pallas as pl
from jax.experimental.pallas import tpu as pltpu

IN_FEATURES = 28 * 28   # 784 -- streamed at full extent (no K padding needed)
HIDDEN = 512
OUT_FEATURES = 10
OUT_PAD = 128           # lane-dense logits slab -> unmasked stores; sliced in wrapper
BASE_TILE_B = 512       # amortizes per-step overhead; well inside v5e scoped VMEM


def _round_up(n, m):
    return ((n + m - 1) // m) * m


def mlp_kernel(x_ref, w1_ref, b1_ref, w2_ref, b2_ref, w3_ref, b3_ref,
               o_ref, h1_ref, h2_ref):
    # Layer 1: (TB, 784) @ (784, 512) on the MXU, fp32 accumulation; bias+ReLU on VPU.
    a1 = jnp.dot(x_ref[...], w1_ref[...], preferred_element_type=jnp.float32)
    h1_ref[...] = jnp.maximum(a1 + b1_ref[...], 0.0).astype(h1_ref.dtype)

    # Layer 2: (TB, 512) @ (512, 512)
    a2 = jnp.dot(h1_ref[...], w2_ref[...], preferred_element_type=jnp.float32)
    h2_ref[...] = jnp.maximum(a2 + b2_ref[...], 0.0).astype(h2_ref.dtype)

    # Layer 3: (TB, 512) @ (512, 128) -- output kept 128-wide, written back as bf16.
    a3 = jnp.dot(h2_ref[...], w3_ref[...], preferred_element_type=jnp.float32)
    o_ref[...] = (a3 + b3_ref[...]).astype(o_ref.dtype)


def init_params(key):
    """Deterministic params mimicking PyTorch nn.Linear default init
    (uniform(-1/sqrt(fan_in), 1/sqrt(fan_in))). Weights stored as (in, out), fp32."""
    dims = [(IN_FEATURES, HIDDEN), (HIDDEN, HIDDEN), (HIDDEN, OUT_FEATURES)]
    params = []
    for fan_in, fan_out in dims:
        key, kw, kb = jax.random.split(key, 3)
        bound = 1.0 / jnp.sqrt(jnp.float32(fan_in))
        w = jax.random.uniform(kw, (fan_in, fan_out), jnp.float32, -bound, bound)
        b = jax.random.uniform(kb, (1, fan_out), jnp.float32, -bound, bound)
        params += [w, b]
    return tuple(params)


def pack_params(params):
    """ONE-TIME packing (call at init, not per forward): bf16 weights, fp32 biases,
    W3/b3 zero-padded to 128 output lanes for unmasked lane-dense stores."""
    w1, b1, w2, b2, w3, b3 = params
    w1p = w1.astype(jnp.bfloat16)                                       # (784, 512)
    w2p = w2.astype(jnp.bfloat16)                                       # (512, 512)
    w3p = jnp.zeros((HIDDEN, OUT_PAD), jnp.bfloat16)
    w3p = w3p.at[:, :OUT_FEATURES].set(w3.astype(jnp.bfloat16))         # (512, 128)
    b3p = jnp.zeros((1, OUT_PAD), jnp.float32).at[:, :OUT_FEATURES].set(b3)
    return (w1p, b1, w2p, b2, w3p, b3p)


@jax.jit
def neural_network_forward(x_nchw, packed_params):
    """x_nchw: (B, 1, 28, 28) float32 -> logits (B, 10) float32."""
    w1p, b1, w2p, b2, w3p, b3p = packed_params
    B = x_nchw.shape[0]

    # nn.Flatten (row-major) + bf16 cast. No K padding: block (TB, 784) is legal
    # because the last block dim equals the full array dim.
    x = x_nchw.reshape(B, -1).astype(jnp.bfloat16)

    # Adaptive batch tile so tiny batches don't pay for a full 512-row tile.
    tile_b = min(BASE_TILE_B, _round_up(B, 16))
    pad_b = _round_up(B, tile_b)
    if pad_b != B:
        x = jnp.pad(x, ((0, pad_b - B), (0, 0)))   # single fused pad, bf16

    out = pl.pallas_call(
        mlp_kernel,
        out_shape=jax.ShapeDtypeStruct((pad_b, OUT_PAD), jnp.bfloat16),
        grid_spec=pltpu.PrefetchScalarGridSpec(
            num_scalar_prefetch=0,
            grid=(pad_b // tile_b,),
            in_specs=[
                pl.BlockSpec((tile_b, IN_FEATURES), lambda i: (i, 0)),  # x (pipelined)
                pl.BlockSpec((IN_FEATURES, HIDDEN), lambda i: (0, 0)),  # w1 (resident)
                pl.BlockSpec((1, HIDDEN), lambda i: (0, 0)),            # b1
                pl.BlockSpec((HIDDEN, HIDDEN), lambda i: (0, 0)),       # w2
                pl.BlockSpec((1, HIDDEN), lambda i: (0, 0)),            # b2
                pl.BlockSpec((HIDDEN, OUT_PAD), lambda i: (0, 0)),      # w3 (padded)
                pl.BlockSpec((1, OUT_PAD), lambda i: (0, 0)),           # b3 (padded)
            ],
            out_specs=pl.BlockSpec((tile_b, OUT_PAD), lambda i: (i, 0)),
            scratch_shapes=[
                pltpu.VMEM((tile_b, HIDDEN), jnp.bfloat16),  # h1
                pltpu.VMEM((tile_b, HIDDEN), jnp.bfloat16),  # h2
            ],
        ),
        compiler_params=pltpu.CompilerParams(
            # On v7x (2 TCs/chip) switch to pltpu.CORE_PARALLEL to split batch
            # tiles across both TensorCores.
            dimension_semantics=("parallel",),
        ),
    )(x, w1p, b1, w2p, b2, w3p, b3p)

    return out[:B, :OUT_FEATURES].astype(jnp.float32)


def reference_forward(x_nchw, packed_params):
    """Pure-JAX reference with the same bf16-weight / fp32-accumulation numerics."""
    w1p, b1, w2p, b2, w3p, b3p = packed_params
    B = x_nchw.shape[0]
    x = x_nchw.reshape(B, -1).astype(jnp.bfloat16)
    h1 = jnp.maximum(
        jnp.dot(x, w1p, preferred_element_type=jnp.float32) + b1, 0.0
    ).astype(jnp.bfloat16)
    h2 = jnp.maximum(
        jnp.dot(h1, w2p, preferred_element_type=jnp.float32) + b2, 0.0
    ).astype(jnp.bfloat16)
    logits = jnp.dot(h2, w3p, preferred_element_type=jnp.float32) + b3p
    return logits[:, :OUT_FEATURES]


if __name__ == "__main__":
    key = jax.random.PRNGKey(0)
    key, kx = jax.random.split(key)
    B = 4
    x = jax.random.normal(kx, (B, 1, 28, 28), jnp.float32)  # NCHW, MNIST-like

    params = init_params(key)
    packed = pack_params(params)   # one-time packing, outside the per-call path

    logits = neural_network_forward(x, packed)
    logits = jax.block_until_ready(logits)

    ref = reference_forward(x, packed)
    assert logits.shape == (B, OUT_FEATURES)
    assert jnp.allclose(logits, ref, atol=2e-2, rtol=2e-2)

    print("KERNEL_OK")
</pallas_src>

<mosaic_0001>
module attributes {stable_mosaic.version = 11 : i64} {
  func.func @mlp_kernel(%arg0: i32, %arg1: memref<16x784xbf16, #tpu.memory_space<vmem>>, %arg2: memref<784x512xbf16, #tpu.memory_space<vmem>>, %arg3: memref<1x512xf32, #tpu.memory_space<vmem>>, %arg4: memref<512x512xbf16, #tpu.memory_space<vmem>>, %arg5: memref<1x512xf32, #tpu.memory_space<vmem>>, %arg6: memref<512x128xbf16, #tpu.memory_space<vmem>>, %arg7: memref<1x128xf32, #tpu.memory_space<vmem>>, %arg8: memref<16x128xbf16, #tpu.memory_space<vmem>>, %arg9: memref<16x512xbf16, #tpu.memory_space<vmem>>, %arg10: memref<16x512xbf16, #tpu.memory_space<vmem>>) attributes {dimension_semantics = [#tpu.dimension_semantics<parallel>], iteration_bounds = array<i64: 1>, scalar_prefetch = 0 : i64, scratch_operands = 2 : i64, tpu.core_type = #tpu.core_type<tc>, window_params = [{transform_indices = @transform_0, window_bounds = array<i64: 16, 784>}, {pipeline_mode = #tpu.pipeline_mode<synchronous>, transform_indices = @transform_1, window_bounds = array<i64: 784, 512>}, {pipeline_mode = #tpu.pipeline_mode<synchronous>, transform_indices = @transform_2, window_bounds = array<i64: 1, 512>}, {pipeline_mode = #tpu.pipeline_mode<synchronous>, transform_indices = @transform_3, window_bounds = array<i64: 512, 512>}, {pipeline_mode = #tpu.pipeline_mode<synchronous>, transform_indices = @transform_4, window_bounds = array<i64: 1, 512>}, {pipeline_mode = #tpu.pipeline_mode<synchronous>, transform_indices = @transform_5, window_bounds = array<i64: 512, 128>}, {pipeline_mode = #tpu.pipeline_mode<synchronous>, transform_indices = @transform_6, window_bounds = array<i64: 1, 128>}, {transform_indices = @transform_7, window_bounds = array<i64: 16, 128>}]} {
    %c0 = arith.constant 0 : index
    %c0_0 = arith.constant 0 : index
    %0 = vector.load %arg1[%c0, %c0_0] : memref<16x784xbf16, #tpu.memory_space<vmem>>, vector<16x784xbf16>
    %c0_1 = arith.constant 0 : index
    %c0_2 = arith.constant 0 : index
    %1 = vector.load %arg2[%c0_1, %c0_2] : memref<784x512xbf16, #tpu.memory_space<vmem>>, vector<784x512xbf16>
    %cst = arith.constant dense<0.000000e+00> : vector<16x512xf32>
    %2 = tpu.matmul %0, %1, %cst {dimension_numbers = #tpu.dot_dimension_numbers<[1], [0], [0], [1], [0, 0, 1, 1], [], []>} : vector<16x784xbf16>, vector<784x512xbf16>, vector<16x512xf32> -> vector<16x512xf32>
    %c0_3 = arith.constant 0 : index
    %c0_4 = arith.constant 0 : index
    %3 = vector.load %arg3[%c0_3, %c0_4] : memref<1x512xf32, #tpu.memory_space<vmem>>, vector<1x512xf32>
    %4 = vector.broadcast %3 : vector<1x512xf32> to vector<16x512xf32>
    %5 = arith.addf %2, %4 : vector<16x512xf32>
    %cst_5 = arith.constant 0.000000e+00 : f32
    %6 = vector.broadcast %cst_5 : f32 to vector<16x512xf32>
    %7 = arith.maximumf %5, %6 : vector<16x512xf32>
    %8 = arith.truncf %7 : vector<16x512xf32> to vector<16x512xbf16>
    %c0_6 = arith.constant 0 : index
    %c0_7 = arith.constant 0 : index
    %9 = vector.load %arg9[%c0_6, %c0_7] : memref<16x512xbf16, #tpu.memory_space<vmem>>, vector<16x512xbf16>
    tpu.vector_store %arg9[%c0_6, %c0_7], %8 {strides = array<i32>} : memref<16x512xbf16, #tpu.memory_space<vmem>>, vector<16x512xbf16>,
    %c0_8 = arith.constant 0 : index
    %c0_9 = arith.constant 0 : index
    %10 = vector.load %arg9[%c0_8, %c0_9] : memref<16x512xbf16, #tpu.memory_space<vmem>>, vector<16x512xbf16>
    %c0_10 = arith.constant 0 : index
    %c0_11 = arith.constant 0 : index
    %11 = vector.load %arg4[%c0_10, %c0_11] : memref<512x512xbf16, #tpu.memory_space<vmem>>, vector<512x512xbf16>
    %cst_12 = arith.constant dense<0.000000e+00> : vector<16x512xf32>
    %12 = tpu.matmul %10, %11, %cst_12 {dimension_numbers = #tpu.dot_dimension_numbers<[1], [0], [0], [1], [0, 0, 1, 1], [], []>} : vector<16x512xbf16>, vector<512x512xbf16>, vector<16x512xf32> -> vector<16x512xf32>
    %c0_13 = arith.constant 0 : index
    %c0_14 = arith.constant 0 : index
    %13 = vector.load %arg5[%c0_13, %c0_14] : memref<1x512xf32, #tpu.memory_space<vmem>>, vector<1x512xf32>
    %14 = vector.broadcast %13 : vector<1x512xf32> to vector<16x512xf32>
    %15 = arith.addf %12, %14 : vector<16x512xf32>
    %cst_15 = arith.constant 0.000000e+00 : f32
    %16 = vector.broadcast %cst_15 : f32 to vector<16x512xf32>
    %17 = arith.maximumf %15, %16 : vector<16x512xf32>
    %18 = arith.truncf %17 : vector<16x512xf32> to vector<16x512xbf16>
    %c0_16 = arith.constant 0 : index
    %c0_17 = arith.constant 0 : index
    %19 = vector.load %arg10[%c0_16, %c0_17] : memref<16x512xbf16, #tpu.memory_space<vmem>>, vector<16x512xbf16>
    tpu.vector_store %arg10[%c0_16, %c0_17], %18 {strides = array<i32>} : memref<16x512xbf16, #tpu.memory_space<vmem>>, vector<16x512xbf16>,
    %c0_18 = arith.constant 0 : index
    %c0_19 = arith.constant 0 : index
    %20 = vector.load %arg10[%c0_18, %c0_19] : memref<16x512xbf16, #tpu.memory_space<vmem>>, vector<16x512xbf16>
    %c0_20 = arith.constant 0 : index
    %c0_21 = arith.constant 0 : index
    %21 = vector.load %arg6[%c0_20, %c0_21] : memref<512x128xbf16, #tpu.memory_space<vmem>>, vector<512x128xbf16>
    %cst_22 = arith.constant dense<0.000000e+00> : vector<16x128xf32>
    %22 = tpu.matmul %20, %21, %cst_22 {dimension_numbers = #tpu.dot_dimension_numbers<[1], [0], [0], [1], [0, 0, 1, 1], [], []>} : vector<16x512xbf16>, vector<512x128xbf16>, vector<16x128xf32> -> vector<16x128xf32>
    %c0_23 = arith.constant 0 : index
    %c0_24 = arith.constant 0 : index
    %23 = vector.load %arg7[%c0_23, %c0_24] : memref<1x128xf32, #tpu.memory_space<vmem>>, vector<1x128xf32>
    %24 = vector.broadcast %23 : vector<1x128xf32> to vector<16x128xf32>
    %25 = arith.addf %22, %24 : vector<16x128xf32>
    %26 = arith.truncf %25 : vector<16x128xf32> to vector<16x128xbf16>
    %c0_25 = arith.constant 0 : index
    %c0_26 = arith.constant 0 : index
    %27 = vector.load %arg8[%c0_25, %c0_26] : memref<16x128xbf16, #tpu.memory_space<vmem>>, vector<16x128xbf16>
    tpu.vector_store %arg8[%c0_25, %c0_26], %26 {strides = array<i32>} : memref<16x128xbf16, #tpu.memory_space<vmem>>, vector<16x128xbf16>,
    return
  }
  func.func @transform_0(%arg0: i32) -> (i32, i32) {
    %c0_i32 = arith.constant 0 : i32
    %c0_i32_0 = arith.constant 0 : i32
    return %arg0, %c0_i32 : i32, i32
  }
  func.func @transform_1(%arg0: i32) -> (i32, i32) {
    %c0_i32 = arith.constant 0 : i32
    %c0_i32_0 = arith.constant 0 : i32
    %c0_i32_1 = arith.constant 0 : i32
    return %c0_i32, %c0_i32_0 : i32, i32
  }
  func.func @transform_2(%arg0: i32) -> (i32, i32) {
    %c0_i32 = arith.constant 0 : i32
    %c0_i32_0 = arith.constant 0 : i32
    %c0_i32_1 = arith.constant 0 : i32
    return %c0_i32, %c0_i32_0 : i32, i32
  }
  func.func @transform_3(%arg0: i32) -> (i32, i32) {
    %c0_i32 = arith.constant 0 : i32
    %c0_i32_0 = arith.constant 0 : i32
    %c0_i32_1 = arith.constant 0 : i32
    return %c0_i32, %c0_i32_0 : i32, i32
  }
  func.func @transform_4(%arg0: i32) -> (i32, i32) {
    %c0_i32 = arith.constant 0 : i32
    %c0_i32_0 = arith.constant 0 : i32
    %c0_i32_1 = arith.constant 0 : i32
    return %c0_i32, %c0_i32_0 : i32, i32
  }
  func.func @transform_5(%arg0: i32) -> (i32, i32) {
    %c0_i32 = arith.constant 0 : i32
    %c0_i32_0 = arith.constant 0 : i32
    %c0_i32_1 = arith.constant 0 : i32
    return %c0_i32, %c0_i32_0 : i32, i32
  }
  func.func @transform_6(%arg0: i32) -> (i32, i32) {
    %c0_i32 = arith.constant 0 : i32
    %c0_i32_0 = arith.constant 0 : i32
    %c0_i32_1 = arith.constant 0 : i32
    return %c0_i32, %c0_i32_0 : i32, i32
  }
  func.func @transform_7(%arg0: i32) -> (i32, i32) {
    %c0_i32 = arith.constant 0 : i32
    %c0_i32_0 = arith.constant 0 : i32
    return %arg0, %c0_i32 : i32, i32
  }
}

</mosaic_0001>

<bundles_post_ra>
// kernel: neural_network_forward.1
= control target key start
LH: loop header
LB: loop body
LE: loop exit
PB: predicated region body
PF: predicated region fallthrough
CT: control target
= control target key end

     0   :  { %12 = vsyncpa [#allocation5], 0  ;;  %s5390_s0 = inlined_call_operand.vmem [shape: bf16[16,784], index: 0, kind: input, shape index: {}]   ;;  %s5391_s1 = inlined_call_operand.hbm [shape: bf16[784,512], index: 1, kind: input, shape index: {}]   ;;  %s5392_s2 = inlined_call_operand.vmem [shape: f32[1,512], index: 2, kind: input, shape index: {}]   ;;  %s5393_s3 = inlined_call_operand.hbm [shape: bf16[512,512], index: 3, kind: input, shape index: {}]   ;;  %s5394_s4 = inlined_call_operand.vmem [shape: f32[1,512], index: 4, kind: input, shape index: {}]   ;;  %s5395_s5 = inlined_call_operand.vmem [shape: bf16[512,128], index: 5, kind: input, shape index: {}]   ;;  %s5396_s6 = inlined_call_operand.vmem [shape: f32[1,128], index: 6, kind: input, shape index: {}]   ;;  %s5397_s7 = inlined_call_operand.vmem [shape: bf16[16,128], index: 7, kind: output, shape index: {}]  }
   0x1   :  { %s20_s26 = sshll.u32 %s5391_s1, 4  ;;  %s21_s26 = int_to_ptr.hbm [resolvable:$true] %s20_s26 }
   0x2   :  { %13 = vsyncpa [#allocation7], 0  ;;  %s5013_s27 = smov [#allocation4]   ;;  %s35_s8 = sshll.u32 %s5393_s3, 4  ;;  %s36_s8 = int_to_ptr.hbm [resolvable:$true] %s35_s8 }
   0x3   :  { %s22_s28 = sshll.u32 %s5013_s27, 4  ;;  %s5014_s9 = smov 256   ;;  %s23_s28 = int_to_ptr.vmem [resolvable:$true] %s22_s28 }
   0x4   :  { %s5015_s10 = smov 16   ;;  %s5016_s11 = smov [#allocation6]  }
   0x5   :  { %28 = dma.hbm_to_vmem [thread:$0]  %s21_s26, 25088, %s23_s28, [#allocation5], %s5014_s9, %s5014_s9, %s5015_s10  }
   0x6   :  { %s37_s12 = sshll.u32 %s5016_s11, 4  ;;  %s38_s12 = int_to_ptr.vmem [resolvable:$true] %s37_s12 }
   0x7   :  { %43 = dma.hbm_to_vmem [thread:$0]  %s36_s8, 16384, %s38_s12, [#allocation7], %s5014_s9, %s5014_s9, %s5015_s10  }
   0x8   :  { %5009 = dma.done.wait [#allocation5], 25088  }
   0x9   :  { %5010 = vsyncadd [#allocation5], 4294942208 }
   0xa   :  { %5011 = dma.done.wait [#allocation7], 16384  }
   0xb   :  { %5012 = vsyncadd [#allocation7], 4294950912  ;;  %v3234_v0 = vld [vmem:[#allocation4 + $0xe0] sm:$0xf]  ;;  %v4617_v1 = vld [vmem:[#allocation4 + $0xec] sm:$0xf0] }
   0xc   :  { %v3362_v2 = vld [vmem:[#allocation4 + $0x1e0] sm:$0xf]  ;;  %v3235_v3 = vor.u32 %v4617_v1, %v3234_v0  ;;  %v4649_v4 = vld [vmem:[#allocation4 + $0x1ec] sm:$0xf0]  ;;  %vm1288_vm0 = vcmask 130048  }
   0xd   :  { %v3490_v5 = vld [vmem:[#allocation4 + $0x2e0] sm:$0xf]  ;;  %v4681_v6 = vld [vmem:[#allocation4 + $0x2ec] sm:$0xf0]  ;;  %v3363_v7 = vor.u32 %v4649_v4, %v3362_v2 }
   0xe   :  { %v3491_v8 = vor.u32 %v4681_v6, %v3490_v5  ;;  %v3618_v9 = vld [vmem:[#allocation4 + $0x3e0] sm:$0xf]  ;;  %v4713_v10 = vld [vmem:[#allocation4 + $0x3ec] sm:$0xf0]  ;;  %1292 = vmatpush.bf16.msra.mxu0 %v3235_v3 }
   0xf   :  { %v3218_v11 = vld [vmem:[#allocation4 + $0xc0] sm:$0xf]  ;;  %v3619_v12 = vor.u32 %v4713_v10, %v3618_v9  ;;  %v4613_v13 = vld [vmem:[#allocation4 + $0xcc] sm:$0xf0]  ;;  %1306 = vmatpush.bf16.msra.mxu1 %v3363_v7 }
  0x10   :  { %v3346_v14 = vld [vmem:[#allocation4 + $0x1c0] sm:$0xf]  ;;  %v4645_v15 = vld [vmem:[#allocation4 + $0x1cc] sm:$0xf0]  ;;  %1320 = vmatpush.bf16.msra.mxu2 %v3491_v8  ;;  %v3219_v16 = vor.u32 %v4613_v13, %v3218_v11 }
  0x11   :  { %v3347_v17 = vor.u32 %v4645_v15, %v3346_v14  ;;  %v3474_v18 = vld [vmem:[#allocation4 + $0x2c0] sm:$0xf]  ;;  %v4677_v19 = vld [vmem:[#allocation4 + $0x2cc] sm:$0xf0]  ;;  %1334 = vmatpush.bf16.msra.mxu3 %v3619_v12 }
  0x12   :  { %v3602_v20 = vld [vmem:[#allocation4 + $0x3c0] sm:$0xf]  ;;  %v3475_v21 = vor.u32 %v4677_v19, %v3474_v18  ;;  %v4709_v22 = vld [vmem:[#allocation4 + $0x3cc] sm:$0xf0]  ;;  %1293 = vmatpush.bf16.msra.mxu0 %v3219_v16 }
  0x13   :  { %v3202_v23 = vld [vmem:[#allocation4 + $0xa0] sm:$0xf]  ;;  %v4609_v24 = vld [vmem:[#allocation4 + $0xac] sm:$0xf0]  ;;  %v3603_v25 = vor.u32 %v4709_v22, %v3602_v20  ;;  %1307 = vmatpush.bf16.msra.mxu1 %v3347_v17 }
  0x14   :  { %v3330_v26 = vld [vmem:[#allocation4 + $0x1a0] sm:$0xf]  ;;  %v4641_v27 = vld [vmem:[#allocation4 + $0x1ac] sm:$0xf0]  ;;  %v3203_v29 = vor.u32 %v4609_v24, %v3202_v23  ;;  %1321 = vmatpush.bf16.msra.mxu2 %v3475_v21 }
  0x15   :  { %v3458_v28 = vld [vmem:[#allocation4 + $0x2a0] sm:$0xf]  ;;  %v4673_v30 = vld [vmem:[#allocation4 + $0x2ac] sm:$0xf0]  ;;  %v3331_v33 = vor.u32 %v4641_v27, %v3330_v26  ;;  %1335 = vmatpush.bf16.msra.mxu3 %v3603_v25 }
  0x16   :  { %v3586_v31 = vld [vmem:[#allocation4 + $0x3a0] sm:$0xf]  ;;  %v4705_v32 = vld [vmem:[#allocation4 + $0x3ac] sm:$0xf0]  ;;  %v3459_v34 = vor.u32 %v4673_v30, %v3458_v28  ;;  %1294 = vmatpush.bf16.msra.mxu0 %v3203_v29 }
  0x17   :  { %v3186_v35 = vld [vmem:[#allocation4 + $0x80] sm:$0xf]  ;;  %v4605_v36 = vld [vmem:[#allocation4 + $0x8c] sm:$0xf0]  ;;  %v3587_v38 = vor.u32 %v4705_v32, %v3586_v31  ;;  %1308 = vmatpush.bf16.msra.mxu1 %v3331_v33  ;;  %v4615_v32 = vld [vmem:[#allocation4 + $0xe4] sm:$0xf] }
  0x18   :  { %v3314_v37 = vld [vmem:[#allocation4 + $0x180] sm:$0xf]  ;;  %v4637_v39 = vld [vmem:[#allocation4 + $0x18c] sm:$0xf0]  ;;  %v3187_v44 = vor.u32 %v4605_v36, %v3186_v35  ;;  %1322 = vmatpush.bf16.msra.mxu2 %v3459_v34  ;;  %v3236_v33 = vld [vmem:[#allocation4 + $0xf0] sm:$0xf0] }
  0x19   :  { %v3442_v40 = vld [vmem:[#allocation4 + $0x280] sm:$0xf]  ;;  %v4669_v41 = vld [vmem:[#allocation4 + $0x28c] sm:$0xf0]  ;;  %v3315_v45 = vor.u32 %v4637_v39, %v3314_v37  ;;  %1336 = vmatpush.bf16.msra.mxu3 %v3587_v38  ;;  %v3102_v34 = vld [vmem:[%s5390_s0 + $0x8] sm:$0xf] }
  0x1a   :  { %v3570_v42 = vld [vmem:[#allocation4 + $0x380] sm:$0xf]  ;;  %v4701_v43 = vld [vmem:[#allocation4 + $0x38c] sm:$0xf0]  ;;  %v3443_v46 = vor.u32 %v4669_v41, %v3442_v40  ;;  %1295 = vmatpush.bf16.msra.mxu0 %v3187_v44  ;;  %v4584_v36 = vld [vmem:[%s5390_s0 + $0x20] sm:$0xf0] }
  0x1b   :  { %v3170_v47 = vld [vmem:[#allocation4 + $0x60] sm:$0xf]  ;;  %v4601_v48 = vld [vmem:[#allocation4 + $0x6c] sm:$0xf0]  ;;  %v3571_v50 = vor.u32 %v4701_v43, %v3570_v42  ;;  %1309 = vmatpush.bf16.msra.mxu1 %v3315_v45  ;;  %v4647_v41 = vld [vmem:[#allocation4 + $0x1e4] sm:$0xf] }
  0x1c   :  { %v3298_v49 = vld [vmem:[#allocation4 + $0x160] sm:$0xf]  ;;  %v4633_v51 = vld [vmem:[#allocation4 + $0x16c] sm:$0xf0]  ;;  %v3171_v56 = vor.u32 %v4601_v48, %v3170_v47  ;;  %1323 = vmatpush.bf16.msra.mxu2 %v3443_v46  ;;  %v4583_v43 = vld [vmem:[%s5390_s0 + $0x18] sm:$0xf0] }
  0x1d   :  { %v3426_v52 = vld [vmem:[#allocation4 + $0x260] sm:$0xf]  ;;  %v4665_v53 = vld [vmem:[#allocation4 + $0x26c] sm:$0xf0]  ;;  %v3299_v57 = vor.u32 %v4633_v51, %v3298_v49  ;;  %1337 = vmatpush.bf16.msra.mxu3 %v3571_v50  ;;  %v3364_v46 = vld [vmem:[#allocation4 + $0x1f0] sm:$0xf0]  ;;  %v3239_v50 = vor.u32 %v4615_v32, %v3236_v33 }
  0x1e   :  { %v3554_v54 = vld [vmem:[#allocation4 + $0x360] sm:$0xf]  ;;  %v4697_v55 = vld [vmem:[#allocation4 + $0x36c] sm:$0xf0]  ;;  %v3427_v58 = vor.u32 %v4665_v53, %v3426_v52  ;;  %1296 = vmatpush.bf16.msra.mxu0 %v3171_v56  ;;  %v4581_v47 = vld [vmem:[%s5390_s0 + $0xc] sm:$0xf] }
  0x1f   :  { %v3154_v59 = vld [vmem:[#allocation4 + $0x40] sm:$0xf]  ;;  %v4597_v60 = vld [vmem:[#allocation4 + $0x4c] sm:$0xf0]  ;;  %v3555_v62 = vor.u32 %v4697_v55, %v3554_v54  ;;  %1310 = vmatpush.bf16.msra.mxu1 %v3299_v57  ;;  %v3104_v48 = vld [vmem:[%s5390_s0 + $0x24] sm:$0xf0]  ;;  %v5081_v54 = vor.u32 %v4584_v36, %v3102_v34 }
  0x20   :  { %v3282_v61 = vld [vmem:[#allocation4 + $0x140] sm:$0xf]  ;;  %v4629_v63 = vld [vmem:[#allocation4 + $0x14c] sm:$0xf0]  ;;  %v3155_v4 = vor.u32 %v4597_v60, %v3154_v59  ;;  %1324 = vmatpush.bf16.msra.mxu2 %v3427_v58  ;;  %v4611_v57 = vld [vmem:[#allocation4 + $0xc4] sm:$0xf]  ;;  %v5085_v60 = vor.u32 %v4581_v47, %v3104_v48 }
  0x21   :  { %v3410_v0 = vld [vmem:[#allocation4 + $0x240] sm:$0xf]  ;;  %v4661_v1 = vld [vmem:[#allocation4 + $0x24c] sm:$0xf0]  ;;  %v3283_v6 = vor.u32 %v4629_v63, %v3282_v61  ;;  %1338 = vmatpush.bf16.msra.mxu3 %v3555_v62  ;;  %v3220_v58 = vld [vmem:[#allocation4 + $0xd0] sm:$0xf0]  ;;  %v3367_v63 = vor.u32 %v4647_v41, %v3364_v46 }
  0x22   :  { %v3538_v2 = vld [vmem:[#allocation4 + $0x340] sm:$0xf]  ;;  %v4693_v3 = vld [vmem:[#allocation4 + $0x34c] sm:$0xf0]  ;;  %v3411_v7 = vor.u32 %v4661_v1, %v3410_v0  ;;  %1297 = vmatpush.bf16.msra.mxu0 %v3155_v4  ;;  %v4580_v61 = vld [vmem:[%s5390_s0 + $0x4] sm:$0xf]  ;;  %v3223_v4 = vor.u32 %v4611_v57, %v3220_v58 }
  0x23   :  { %v3138_v5 = vld [vmem:[#allocation4 + $0x20] sm:$0xf]  ;;  %v4593_v8 = vld [vmem:[#allocation4 + $0x2c] sm:$0xf0]  ;;  %v3539_v11 = vor.u32 %v4693_v3, %v3538_v2  ;;  %1311 = vmatpush.bf16.msra.mxu1 %v3283_v6  ;;  %v4643_v1 = vld [vmem:[#allocation4 + $0x1c4] sm:$0xf] }
  0x24   :  { %v3266_v9 = vld [vmem:[#allocation4 + $0x120] sm:$0xf]  ;;  %v4625_v10 = vld [vmem:[#allocation4 + $0x12c] sm:$0xf0]  ;;  %v3139_v18 = vor.u32 %v4593_v8, %v3138_v5  ;;  %1325 = vmatpush.bf16.msra.mxu2 %v3411_v7  ;;  %v3348_v2 = vld [vmem:[#allocation4 + $0x1d0] sm:$0xf0] }
  0x25   :  { %v3394_v12 = vld [vmem:[#allocation4 + $0x220] sm:$0xf]  ;;  %v4657_v13 = vld [vmem:[#allocation4 + $0x22c] sm:$0xf0]  ;;  %v3267_v23 = vor.u32 %v4625_v10, %v3266_v9  ;;  %1339 = vmatpush.bf16.msra.mxu3 %v3539_v11  ;;  %v4607_v10 = vld [vmem:[#allocation4 + $0xa4] sm:$0xf] }
  0x26   :  { %v3522_v14 = vld [vmem:[#allocation4 + $0x320] sm:$0xf]  ;;  %v4689_v15 = vld [vmem:[#allocation4 + $0x32c] sm:$0xf0]  ;;  %v3395_v24 = vor.u32 %v4657_v13, %v3394_v12  ;;  %1298 = vmatpush.bf16.msra.mxu0 %v3139_v18  ;;  %v3204_v11 = vld [vmem:[#allocation4 + $0xb0] sm:$0xf0]  ;;  %v3351_v12 = vor.u32 %v4643_v1, %v3348_v2 }
  0x27   :  { %v3122_v16 = vld [vmem:[#allocation4] sm:$0xf]  ;;  %v4589_v17 = vld [vmem:[#allocation4 + $0xc] sm:$0xf0]  ;;  %v3523_v28 = vor.u32 %v4689_v15, %v3522_v14  ;;  %1312 = vmatpush.bf16.msra.mxu1 %v3267_v23  ;;  %v4639_v14 = vld [vmem:[#allocation4 + $0x1a4] sm:$0xf] }
  0x28   :  { %v3250_v19 = vld [vmem:[#allocation4 + $0x100] sm:$0xf]  ;;  %v4621_v20 = vld [vmem:[#allocation4 + $0x10c] sm:$0xf0]  ;;  %v3123_v35 = vor.u32 %v4589_v17, %v3122_v16  ;;  %1326 = vmatpush.bf16.msra.mxu2 %v3395_v24  ;;  %v3332_v15 = vld [vmem:[#allocation4 + $0x1b0] sm:$0xf0]  ;;  %v3207_v17 = vor.u32 %v4607_v10, %v3204_v11 }
  0x29   :  { %v3378_v21 = vld [vmem:[#allocation4 + $0x200] sm:$0xf]  ;;  %v4653_v22 = vld [vmem:[#allocation4 + $0x20c] sm:$0xf0]  ;;  %v3251_v39 = vor.u32 %v4621_v20, %v3250_v19  ;;  %1340 = vmatpush.bf16.msra.mxu3 %v3523_v28  ;;  %v3188_v23 = vld [vmem:[#allocation4 + $0x90] sm:$0xf0]  ;;  %v3335_v24 = vor.u32 %v4639_v14, %v3332_v15 }
  0x2a   :  { %v3506_v25 = vld [vmem:[#allocation4 + $0x300] sm:$0xf]  ;;  %v4685_v26 = vld [vmem:[#allocation4 + $0x30c] sm:$0xf0]  ;;  %v3379_v40 = vor.u32 %v4653_v22, %v3378_v21  ;;  %1299 = vmatpush.bf16.msra.mxu0 %v3123_v35  ;;  %v4603_v22 = vld [vmem:[#allocation4 + $0x84] sm:$0xf] }
  0x2b   :  { %v3746_v27 = vld [vmem:[#allocation4 + $0x4e0] sm:$0xf]  ;;  %v4745_v29 = vld [vmem:[#allocation4 + $0x4ec] sm:$0xf0]  ;;  %v3507_v44 = vor.u32 %v4685_v26, %v3506_v25  ;;  %1313 = vmatpush.bf16.msra.mxu1 %v3251_v39  ;;  %v4635_v26 = vld [vmem:[#allocation4 + $0x184] sm:$0xf] }
  0x2c   :  { %v3874_v30 = vld [vmem:[#allocation4 + $0x5e0] sm:$0xf]  ;;  %v4777_v31 = vld [vmem:[#allocation4 + $0x5ec] sm:$0xf0]  ;;  %v3747_v45 = vor.u32 %v4745_v29, %v3746_v27  ;;  %1327 = vmatpush.bf16.msra.mxu2 %v3379_v40  ;;  %v3316_v27 = vld [vmem:[#allocation4 + $0x190] sm:$0xf0]  ;;  %v3191_v29 = vor.u32 %v4603_v22, %v3188_v23 }
  0x2d   :  { %v3890_v37 = vld [vmem:[#allocation4 + $0x600] sm:$0xf]  ;;  %v4781_v38 = vld [vmem:[#allocation4 + $0x60c] sm:$0xf0]  ;;  %v3875_v49 = vor.u32 %v4777_v31, %v3874_v30  ;;  %1341 = vmatpush.bf16.msra.mxu3 %v3507_v44  ;;  %v4599_v34 = vld [vmem:[#allocation4 + $0x64] sm:$0xf] }
  0x2e   :  { %v3094_v42 = vld [vmem:[%s5390_s0] sm:$0xf]  ;;  %v4741_v52 = vld [vmem:[#allocation4 + $0x4cc] sm:$0xf0]  ;;  %v3891_v59 = vor.u32 %v4781_v38, %v3890_v37  ;;  %1348 = vmatpush.bf16.msrb.mxu0 %v3747_v45  ;;  %v3172_v35 = vld [vmem:[#allocation4 + $0x70] sm:$0xf0]  ;;  %v3319_v38 = vor.u32 %v4635_v26, %v3316_v27 }
  0x2f   :  { %v3730_v51 = vld [vmem:[#allocation4 + $0x4c0] sm:$0xf]  ;;  %v5083_v55 = vor.u32 %v4583_v43, %v3094_v42  ;;  %v4773_v56 = vld [vmem:[#allocation4 + $0x5cc] sm:$0xf0]  ;;  %1362 = vmatpush.bf16.msrb.mxu1 %v3875_v49  ;;  %1328 = vmatmul.bf16.vlgmr.msra.gmra.mxu2 %v5081_v54  ;;  %v3118_v36 = vld [vmem:[%s5390_s0 + $0x18] sm:$0xf]  ;;  %v3175_v43 = vor.u32 %v4599_v34, %v3172_v35 }
  0x30   :  { %v3858_v53 = vld [vmem:[#allocation4 + $0x5c0] sm:$0xf]  ;;  %v3731_v0 = vor.u32 %v4741_v52, %v3730_v51  ;;  %v4737_v6 = vld [vmem:[#allocation4 + $0x4ac] sm:$0xf0]  ;;  %1383 = vmatpush.bf16.msrb.mxu2 %v3891_v59  ;;  %1342 = vmatmul.bf16.vlgmr.msra.gmra.mxu3 %v5085_v60  ;;  %v4586_v37 = vld [vmem:[%s5390_s0 + $0x30] sm:$0xf0] }
  0x31   :  { %v3096_v62 = vld [vmem:[%s5390_s0 + $0x1c] sm:$0xf0]  ;;  %1390 = vmatpush.bf16.msrb.mxu3 %v3239_v50  ;;  %v3859_v3 = vor.u32 %v4773_v56, %v3858_v53  ;;  %1300 = vmatmul.bf16.vlgmr.msra.gmra.mxu0 %v5083_v55  ;;  %v4769_v9 = vld [vmem:[#allocation4 + $0x5ac] sm:$0xf0]  ;;  %v4631_v40 = vld [vmem:[#allocation4 + $0x164] sm:$0xf]  ;;  %v5105_v50 = vor.u32 %v4586_v37, %v3118_v36 }
  0x32   :  { %v3714_v5 = vld [vmem:[#allocation4 + $0x4a0] sm:$0xf]  ;;  %v5095_v8 = vor.u32 %v4580_v61, %v3096_v62  ;;  %1349 = vmatpush.bf16.msrb.mxu0 %v3731_v0  ;;  %v4733_v19 = vld [vmem:[#allocation4 + $0x48c] sm:$0xf0]  ;;  %v3300_v41 = vld [vmem:[#allocation4 + $0x170] sm:$0xf0] }
  0x33   :  { %v3842_v7 = vld [vmem:[#allocation4 + $0x5a0] sm:$0xf]  ;;  %v3715_v13 = vor.u32 %v4737_v6, %v3714_v5  ;;  %1363 = vmatpush.bf16.msrb.mxu1 %v3859_v3  ;;  %v4765_v21 = vld [vmem:[#allocation4 + $0x58c] sm:$0xf0]  ;;  %v4595_v48 = vld [vmem:[#allocation4 + $0x44] sm:$0xf]  ;;  %v3303_v51 = vor.u32 %v4631_v40, %v3300_v41 }
  0x34   :  { %1404 = vmatpush.bf16.msra.mxu2 %v3367_v63  ;;  %v3843_v16 = vor.u32 %v4769_v9, %v3842_v7  ;;  %v3698_v18 = vld [vmem:[#allocation4 + $0x480] sm:$0xf]  ;;  %1314 = vmatmul.bf16.vlgmr.msra.gmra.mxu1 %v5095_v8  ;;  %v4729_v31 = vld [vmem:[#allocation4 + $0x46c] sm:$0xf0]  ;;  %v3156_v49 = vld [vmem:[#allocation4 + $0x50] sm:$0xf0] }
  0x35   :  { %1391 = vmatpush.bf16.msrb.mxu3 %v3223_v4  ;;  %v3826_v20 = vld [vmem:[#allocation4 + $0x580] sm:$0xf]  ;;  %v3699_v25 = vor.u32 %v4733_v19, %v3698_v18  ;;  %v4761_v33 = vld [vmem:[#allocation4 + $0x56c] sm:$0xf0]  ;;  %v4627_v53 = vld [vmem:[#allocation4 + $0x144] sm:$0xf]  ;;  %v3159_v58 = vor.u32 %v4595_v48, %v3156_v49 }
  0x36   :  { %1350 = vmatpush.bf16.msrb.mxu0 %v3715_v13  ;;  %v3827_v28 = vor.u32 %v4765_v21, %v3826_v20  ;;  %v3682_v30 = vld [vmem:[#allocation4 + $0x460] sm:$0xf]  ;;  %v4725_v45 = vld [vmem:[#allocation4 + $0x44c] sm:$0xf0]  ;;  %v3284_v56 = vld [vmem:[#allocation4 + $0x150] sm:$0xf0] }
  0x37   :  { %1364 = vmatpush.bf16.msrb.mxu1 %v3843_v16  ;;  %v3810_v32 = vld [vmem:[#allocation4 + $0x560] sm:$0xf]  ;;  %v3683_v39 = vor.u32 %v4729_v31, %v3682_v30  ;;  %v4757_v47 = vld [vmem:[#allocation4 + $0x54c] sm:$0xf0]  ;;  %v4591_v0 = vld [vmem:[#allocation4 + $0x24] sm:$0xf]  ;;  %v3287_v4 = vor.u32 %v4627_v53, %v3284_v56 }
  0x38   :  { %1405 = vmatpush.bf16.msra.mxu2 %v3351_v12  ;;  %v3811_v42 = vor.u32 %v4761_v33, %v3810_v32  ;;  %v3666_v44 = vld [vmem:[#allocation4 + $0x440] sm:$0xf]  ;;  %v4721_v61 = vld [vmem:[#allocation4 + $0x42c] sm:$0xf0]  ;;  %v3140_v1 = vld [vmem:[#allocation4 + $0x30] sm:$0xf0] }
  0x39   :  { %1392 = vmatpush.bf16.msrb.mxu3 %v3207_v17  ;;  %v3794_v46 = vld [vmem:[#allocation4 + $0x540] sm:$0xf]  ;;  %v3667_v52 = vor.u32 %v4725_v45, %v3666_v44  ;;  %v4753_v63 = vld [vmem:[#allocation4 + $0x52c] sm:$0xf0]  ;;  %v4623_v2 = vld [vmem:[#allocation4 + $0x124] sm:$0xf]  ;;  %v3143_v11 = vor.u32 %v4591_v0, %v3140_v1 }
  0x3a   :  { %1351 = vmatpush.bf16.msrb.mxu0 %v3699_v25  ;;  %v3795_v57 = vor.u32 %v4757_v47, %v3794_v46  ;;  %v3650_v59 = vld [vmem:[#allocation4 + $0x420] sm:$0xf]  ;;  %v3268_v3 = vld [vmem:[#allocation4 + $0x130] sm:$0xf0]  ;;  %v4717_v7 = vld [vmem:[#allocation4 + $0x40c] sm:$0xf0] }
  0x3b   :  { %1365 = vmatpush.bf16.msrb.mxu1 %v3827_v28  ;;  %v3778_v62 = vld [vmem:[#allocation4 + $0x520] sm:$0xf]  ;;  %v3651_v5 = vor.u32 %v4721_v61, %v3650_v59  ;;  %v4749_v12 = vld [vmem:[#allocation4 + $0x50c] sm:$0xf0]  ;;  %v4587_v13 = vld [vmem:[#allocation4 + $0x4] sm:$0xf]  ;;  %v3271_v21 = vor.u32 %v4623_v2, %v3268_v3 }
  0x3c   :  { %1406 = vmatpush.bf16.msra.mxu2 %v3335_v24  ;;  %v3634_v6 = vld [vmem:[#allocation4 + $0x400] sm:$0xf]  ;;  %v3779_v10 = vor.u32 %v4753_v63, %v3778_v62  ;;  %v3124_v14 = vld [vmem:[#allocation4 + $0x10] sm:$0xf0]  ;;  %v4679_v15 = vld [vmem:[#allocation4 + $0x2e4] sm:$0xf] }
  0x3d   :  { %1393 = vmatpush.bf16.msrb.mxu3 %v3191_v29  ;;  %v3762_v9 = vld [vmem:[#allocation4 + $0x500] sm:$0xf]  ;;  %v3492_v16 = vld [vmem:[#allocation4 + $0x2f0] sm:$0xf0]  ;;  %v4711_v17 = vld [vmem:[#allocation4 + $0x3e4] sm:$0xf]  ;;  %v3635_v22 = vor.u32 %v4717_v7, %v3634_v6  ;;  %v3127_v27 = vor.u32 %v4587_v13, %v3124_v14 }
  0x3e   :  { %1352 = vmatpush.bf16.msrb.mxu0 %v3683_v39  ;;  %v3620_v18 = vld [vmem:[#allocation4 + $0x3f0] sm:$0xf0]  ;;  %v4743_v19 = vld [vmem:[#allocation4 + $0x4e4] sm:$0xf]  ;;  %v3110_v23 = vld [vmem:[%s5390_s0 + $0x10] sm:$0xf]  ;;  %v3763_v26 = vor.u32 %v4749_v12, %v3762_v9  ;;  %v3495_v31 = vor.u32 %v4679_v15, %v3492_v16 }
  0x3f   :  { %1366 = vmatpush.bf16.msrb.mxu1 %v3811_v42  ;;  %3904 = vmatmul.msk.bf16.vlgmr.msrb.gmra.mxu2 %vm1288_vm0, %v5105_v50  ;;  %v3748_v20 = vld [vmem:[#allocation4 + $0x4f0] sm:$0xf0]  ;;  %v4585_v24 = vld [vmem:[%s5390_s0 + $0x28] sm:$0xf0]  ;;  %v4619_v25 = vld [vmem:[#allocation4 + $0x104] sm:$0xf]  ;;  %v3623_v32 = vor.u32 %v4711_v17, %v3620_v18 }
  0x40   :  { %1407 = vmatpush.bf16.msra.mxu2 %v3319_v38  ;;  %v3252_v28 = vld [vmem:[#allocation4 + $0x110] sm:$0xf0]  ;;  %v3112_v30 = vld [vmem:[%s5390_s0 + $0x2c] sm:$0xf0]  ;;  %v4775_v33 = vld [vmem:[#allocation4 + $0x5e4] sm:$0xf]  ;;  %v3751_v36 = vor.u32 %v4743_v19, %v3748_v20  ;;  %v5121_v37 = vor.u32 %v4585_v24, %v3110_v23 }
  0x41   :  { %1394 = vmatpush.bf16.msrb.mxu3 %v3175_v43  ;;  %v4582_v29 = vld [vmem:[%s5390_s0 + $0x14] sm:$0xf]  ;;  %v4675_v35 = vld [vmem:[#allocation4 + $0x2c4] sm:$0xf]  ;;  %v3255_v41 = vor.u32 %v4619_v25, %v3252_v28 }
  0x42   :  { %1353 = vmatpush.bf16.msrb.mxu0 %v3667_v52  ;;  %v3876_v34 = vld [vmem:[#allocation4 + $0x5f0] sm:$0xf0]  ;;  %v4707_v39 = vld [vmem:[#allocation4 + $0x3c4] sm:$0xf]  ;;  %v5123_v42 = vor.u32 %v4582_v29, %v3112_v30 }
  0x43   :  { %1367 = vmatpush.bf16.msrb.mxu1 %v3795_v57  ;;  %v3476_v38 = vld [vmem:[#allocation4 + $0x2d0] sm:$0xf0]  ;;  %v4739_v43 = vld [vmem:[#allocation4 + $0x4c4] sm:$0xf]  ;;  %v3879_v45 = vor.u32 %v4775_v33, %v3876_v34 }
  0x44   :  { %1408 = vmatpush.bf16.msra.mxu2 %v3303_v51  ;;  %v3604_v40 = vld [vmem:[#allocation4 + $0x3d0] sm:$0xf0]  ;;  %v3479_v46 = vor.u32 %v4675_v35, %v3476_v38  ;;  %v4771_v48 = vld [vmem:[#allocation4 + $0x5c4] sm:$0xf] }
  0x45   :  { %1395 = vmatpush.bf16.msrb.mxu3 %v3159_v58  ;;  %v3732_v44 = vld [vmem:[#allocation4 + $0x4d0] sm:$0xf0]  ;;  %v3607_v47 = vor.u32 %v4707_v39, %v3604_v40  ;;  %v4671_v51 = vld [vmem:[#allocation4 + $0x2a4] sm:$0xf] }
  0x46   :  { %1354 = vmatpush.bf16.msrb.mxu0 %v3651_v5  ;;  %v3860_v49 = vld [vmem:[#allocation4 + $0x5d0] sm:$0xf0]  ;;  %v3735_v52 = vor.u32 %v4739_v43, %v3732_v44  ;;  %v4703_v56 = vld [vmem:[#allocation4 + $0x3a4] sm:$0xf] }
  0x47   :  { %1368 = vmatpush.bf16.msrb.mxu1 %v3779_v10  ;;  %v3460_v53 = vld [vmem:[#allocation4 + $0x2b0] sm:$0xf0]  ;;  %v4735_v58 = vld [vmem:[#allocation4 + $0x4a4] sm:$0xf]  ;;  %v3863_v61 = vor.u32 %v4771_v48, %v3860_v49 }
  0x48   :  { %1409 = vmatpush.bf16.msra.mxu2 %v3287_v4  ;;  %v3588_v57 = vld [vmem:[#allocation4 + $0x3b0] sm:$0xf0]  ;;  %v3463_v62 = vor.u32 %v4671_v51, %v3460_v53  ;;  %v4767_v0 = vld [vmem:[#allocation4 + $0x5a4] sm:$0xf] }
  0x49   :  { %1396 = vmatpush.bf16.msrb.mxu3 %v3143_v11  ;;  %v3716_v59 = vld [vmem:[#allocation4 + $0x4b0] sm:$0xf0]  ;;  %v3591_v63 = vor.u32 %v4703_v56, %v3588_v57  ;;  %v4667_v2 = vld [vmem:[#allocation4 + $0x284] sm:$0xf] }
  0x4a   :  { %1355 = vmatpush.bf16.msrb.mxu0 %v3635_v22  ;;  %v3844_v1 = vld [vmem:[#allocation4 + $0x5b0] sm:$0xf0]  ;;  %v3719_v3 = vor.u32 %v4735_v58, %v3716_v59  ;;  %v4699_v5 = vld [vmem:[#allocation4 + $0x384] sm:$0xf] }
  0x4b   :  { %1369 = vmatpush.bf16.msrb.mxu1 %v3763_v26  ;;  %v3444_v4 = vld [vmem:[#allocation4 + $0x290] sm:$0xf0]  ;;  %v4731_v7 = vld [vmem:[#allocation4 + $0x484] sm:$0xf]  ;;  %v3847_v10 = vor.u32 %v4767_v0, %v3844_v1  ;;  %v3242_v0 = vld [vmem:[#allocation4 + $0xe8] sm:$0xf] }
  0x4c   :  { %1410 = vmatpush.bf16.msra.mxu2 %v3271_v21  ;;  %v3572_v6 = vld [vmem:[#allocation4 + $0x390] sm:$0xf0]  ;;  %v3447_v11 = vor.u32 %v4667_v2, %v3444_v4  ;;  %v4763_v13 = vld [vmem:[#allocation4 + $0x584] sm:$0xf]  ;;  %v4618_v1 = vld [vmem:[#allocation4 + $0xf4] sm:$0xf0] }
  0x4d   :  { %1397 = vmatpush.bf16.msrb.mxu3 %v3127_v27  ;;  %1356 = vmatmul.bf16.vlgmr.msrb.gmra.mxu0 %v5121_v37  ;;  %v3700_v9 = vld [vmem:[#allocation4 + $0x490] sm:$0xf0]  ;;  %v3575_v12 = vor.u32 %v4699_v5, %v3572_v6  ;;  %v4663_v15 = vld [vmem:[#allocation4 + $0x264] sm:$0xf]  ;;  %v3498_v5 = vld [vmem:[#allocation4 + $0x2e8] sm:$0xf] }
  0x4e   :  { %1418 = vmatpush.bf16.msra.mxu0 %v3495_v31  ;;  %1370 = vmatmul.bf16.vlgmr.msrb.gmra.mxu1 %v5123_v42  ;;  %v3828_v14 = vld [vmem:[#allocation4 + $0x590] sm:$0xf0]  ;;  %v3703_v16 = vor.u32 %v4731_v7, %v3700_v9  ;;  %v4695_v18 = vld [vmem:[#allocation4 + $0x364] sm:$0xf]  ;;  %v4682_v6 = vld [vmem:[#allocation4 + $0x2f4] sm:$0xf0] }
  0x4f   :  { %1432 = vmatpush.bf16.msra.mxu1 %v3623_v32  ;;  %v3428_v17 = vld [vmem:[#allocation4 + $0x270] sm:$0xf0]  ;;  %v4727_v20 = vld [vmem:[#allocation4 + $0x464] sm:$0xf]  ;;  %v3831_v22 = vor.u32 %v4763_v13, %v3828_v14  ;;  %v3243_v13 = vor.u32 %v4618_v1, %v3242_v0  ;;  %v3626_v14 = vld [vmem:[#allocation4 + $0x3e8] sm:$0xf] }
  0x50   :  { %1411 = vmatpush.bf16.msra.mxu2 %v3255_v41  ;;  %1398 = vmatmul.bf16.vlgmr.msrb.gmra.mxu3 %v5083_v55  ;;  %v3556_v19 = vld [vmem:[#allocation4 + $0x370] sm:$0xf0]  ;;  %v3431_v23 = vor.u32 %v4663_v15, %v3428_v17  ;;  %v4759_v25 = vld [vmem:[#allocation4 + $0x564] sm:$0xf]  ;;  %v4714_v15 = vld [vmem:[#allocation4 + $0x3f4] sm:$0xf0] }
  0x51   :  { %1446 = vmatpush.bf16.msra.mxu3 %v3751_v36  ;;  %v3684_v21 = vld [vmem:[#allocation4 + $0x470] sm:$0xf0]  ;;  %v3559_v24 = vor.u32 %v4695_v18, %v3556_v19  ;;  %v4659_v27 = vld [vmem:[#allocation4 + $0x244] sm:$0xf]  ;;  %v3370_v17 = vld [vmem:[#allocation4 + $0x1e8] sm:$0xf]  ;;  %v3499_v19 = vor.u32 %v4682_v6, %v3498_v5 }
  0x52   :  { %1419 = vmatpush.bf16.msra.mxu0 %v3479_v46  ;;  %v3812_v26 = vld [vmem:[#allocation4 + $0x570] sm:$0xf0]  ;;  %v3687_v28 = vor.u32 %v4727_v20, %v3684_v21  ;;  %v4691_v30 = vld [vmem:[#allocation4 + $0x344] sm:$0xf]  ;;  %v4650_v18 = vld [vmem:[#allocation4 + $0x1f4] sm:$0xf0] }
  0x53   :  { %1433 = vmatpush.bf16.msra.mxu1 %v3607_v47  ;;  %1412 = vmatmul.bf16.vlgmr.msra.gmra.mxu2 %v5095_v8  ;;  %v3412_v29 = vld [vmem:[#allocation4 + $0x250] sm:$0xf0]  ;;  %v4723_v32 = vld [vmem:[#allocation4 + $0x444] sm:$0xf]  ;;  %v3815_v34 = vor.u32 %v4759_v25, %v3812_v26  ;;  %v3226_v21 = vld [vmem:[#allocation4 + $0xc8] sm:$0xf]  ;;  %v3371_v26 = vor.u32 %v4650_v18, %v3370_v17 }
  0x54   :  { %1460 = vmatpush.bf16.msrb.mxu2 %v3879_v45  ;;  %v3540_v31 = vld [vmem:[#allocation4 + $0x350] sm:$0xf0]  ;;  %v3415_v35 = vor.u32 %v4659_v27, %v3412_v29  ;;  %v4755_v38 = vld [vmem:[#allocation4 + $0x544] sm:$0xf]  ;;  %v4678_v25 = vld [vmem:[#allocation4 + $0x2d4] sm:$0xf0] }
  0x55   :  { %1447 = vmatpush.bf16.msra.mxu3 %v3735_v52  ;;  %v3668_v33 = vld [vmem:[#allocation4 + $0x450] sm:$0xf0]  ;;  %v3543_v36 = vor.u32 %v4691_v30, %v3540_v31  ;;  %v4655_v40 = vld [vmem:[#allocation4 + $0x224] sm:$0xf]  ;;  %v3610_v27 = vld [vmem:[#allocation4 + $0x3c8] sm:$0xf] }
  0x56   :  { %1420 = vmatpush.bf16.msra.mxu0 %v3463_v62  ;;  %v3796_v39 = vld [vmem:[#allocation4 + $0x550] sm:$0xf0]  ;;  %v3671_v41 = vor.u32 %v4723_v32, %v3668_v33  ;;  %v4687_v44 = vld [vmem:[#allocation4 + $0x324] sm:$0xf]  ;;  %v3354_v30 = vld [vmem:[#allocation4 + $0x1c8] sm:$0xf] }
  0x57   :  { %1434 = vmatpush.bf16.msra.mxu1 %v3591_v63  ;;  %v3396_v43 = vld [vmem:[#allocation4 + $0x230] sm:$0xf0]  ;;  %v4719_v46 = vld [vmem:[#allocation4 + $0x424] sm:$0xf]  ;;  %v3799_v48 = vor.u32 %v4755_v38, %v3796_v39  ;;  %v4646_v31 = vld [vmem:[#allocation4 + $0x1d4] sm:$0xf0] }
  0x58   :  { %1461 = vmatpush.bf16.msrb.mxu2 %v3863_v61  ;;  %v3524_v45 = vld [vmem:[#allocation4 + $0x330] sm:$0xf0]  ;;  %v4751_v49 = vld [vmem:[#allocation4 + $0x524] sm:$0xf]  ;;  %v3399_v52 = vor.u32 %v4655_v40, %v3396_v43  ;;  %v3210_v33 = vld [vmem:[#allocation4 + $0xa8] sm:$0xf]  ;;  %v3355_v39 = vor.u32 %v4646_v31, %v3354_v30 }
  0x59   :  { %1448 = vmatpush.bf16.msra.mxu3 %v3719_v3  ;;  %v3652_v47 = vld [vmem:[#allocation4 + $0x430] sm:$0xf0]  ;;  %v3527_v53 = vor.u32 %v4687_v44, %v3524_v45  ;;  %v4651_v56 = vld [vmem:[#allocation4 + $0x204] sm:$0xf]  ;;  %v4674_v38 = vld [vmem:[#allocation4 + $0x2b4] sm:$0xf0] }
  0x5a   :  { %1421 = vmatpush.bf16.msra.mxu0 %v3447_v11  ;;  %v3780_v51 = vld [vmem:[#allocation4 + $0x530] sm:$0xf0]  ;;  %v4683_v58 = vld [vmem:[#allocation4 + $0x304] sm:$0xf]  ;;  %v3655_v59 = vor.u32 %v4719_v46, %v3652_v47  ;;  %v3594_v40 = vld [vmem:[#allocation4 + $0x3a8] sm:$0xf] }
  0x5b   :  { %1435 = vmatpush.bf16.msra.mxu1 %v3575_v12  ;;  %v3380_v57 = vld [vmem:[#allocation4 + $0x210] sm:$0xf0]  ;;  %v4715_v62 = vld [vmem:[#allocation4 + $0x404] sm:$0xf]  ;;  %v3783_v3 = vor.u32 %v4751_v49, %v3780_v51  ;;  %v3338_v44 = vld [vmem:[#allocation4 + $0x1a8] sm:$0xf] }
  0x5c   :  { %1462 = vmatpush.bf16.msrb.mxu2 %v3847_v10  ;;  %v3508_v61 = vld [vmem:[#allocation4 + $0x310] sm:$0xf0]  ;;  %v4779_v2 = vld [vmem:[#allocation4 + $0x604] sm:$0xf]  ;;  %v3383_v7 = vor.u32 %v4651_v56, %v3380_v57  ;;  %v4642_v45 = vld [vmem:[#allocation4 + $0x1b4] sm:$0xf0] }
  0x5d   :  { %1449 = vmatpush.bf16.msra.mxu3 %v3703_v16  ;;  %v3636_v63 = vld [vmem:[#allocation4 + $0x410] sm:$0xf0]  ;;  %v3511_v9 = vor.u32 %v4683_v58, %v3508_v61  ;;  %v4747_v10 = vld [vmem:[#allocation4 + $0x504] sm:$0xf]  ;;  %v3194_v47 = vld [vmem:[#allocation4 + $0x88] sm:$0xf] }
  0x5e   :  { %1422 = vmatpush.bf16.msra.mxu0 %v3431_v23  ;;  %v3892_v4 = vld [vmem:[#allocation4 + $0x610] sm:$0xf0]  ;;  %v3639_v12 = vor.u32 %v4715_v62, %v3636_v63  ;;  %v3627_v23 = vor.u32 %v4714_v15, %v3626_v14  ;;  %v3450_v51 = vld [vmem:[#allocation4 + $0x288] sm:$0xf]  ;;  %v4702_v57 = vld [vmem:[#allocation4 + $0x394] sm:$0xf0] }
  0x5f   :  { %1436 = vmatpush.bf16.msra.mxu1 %v3559_v24  ;;  %v3764_v11 = vld [vmem:[#allocation4 + $0x510] sm:$0xf0]  ;;  %v3895_v16 = vor.u32 %v4779_v2, %v3892_v4  ;;  %v3482_v24 = vld [vmem:[#allocation4 + $0x2c8] sm:$0xf]  ;;  %v4638_v61 = vld [vmem:[#allocation4 + $0x194] sm:$0xf0] }
  0x60   :  { %1463 = vmatpush.bf16.msrb.mxu2 %v3831_v22  ;;  %v3767_v20 = vor.u32 %v4747_v10, %v3764_v11  ;;  %v4614_v22 = vld [vmem:[#allocation4 + $0xd4] sm:$0xf0]  ;;  %v3483_v32 = vor.u32 %v4678_v25, %v3482_v24  ;;  %v3578_v56 = vld [vmem:[#allocation4 + $0x388] sm:$0xf] }
  0x61   :  { %1450 = vmatpush.bf16.msra.mxu3 %v3687_v28  ;;  %v4710_v28 = vld [vmem:[#allocation4 + $0x3d4] sm:$0xf0]  ;;  %v3227_v29 = vor.u32 %v4614_v22, %v3226_v21  ;;  %v3178_v63 = vld [vmem:[#allocation4 + $0x68] sm:$0xf]  ;;  %v3579_v1 = vor.u32 %v4702_v57, %v3578_v56  ;;  %v4616_v56 = vld [vmem:[#allocation4 + $0xec] sm:$0xf] }
  0x62   :  { %1423 = vmatpush.bf16.msra.mxu0 %v3415_v35  ;;  %v3611_v35 = vor.u32 %v4710_v28, %v3610_v27  ;;  %v4602_v0 = vld [vmem:[#allocation4 + $0x74] sm:$0xf0]  ;;  %v3434_v2 = vld [vmem:[#allocation4 + $0x268] sm:$0xf]  ;;  %v3244_v57 = vld [vmem:[#allocation4 + $0xf8] sm:$0xf0] }
  0x63   :  { %1437 = vmatpush.bf16.msra.mxu1 %v3543_v36  ;;  %v3466_v36 = vld [vmem:[#allocation4 + $0x2a8] sm:$0xf]  ;;  %v4698_v6 = vld [vmem:[#allocation4 + $0x374] sm:$0xf0] }
  0x64   :  { %1464 = vmatpush.bf16.msrb.mxu2 %v3815_v34  ;;  %v4610_v34 = vld [vmem:[#allocation4 + $0xb4] sm:$0xf0]  ;;  %v3467_v46 = vor.u32 %v4674_v38, %v3466_v36  ;;  %v3562_v5 = vld [vmem:[#allocation4 + $0x368] sm:$0xf] }
  0x65   :  { %1451 = vmatpush.bf16.msra.mxu3 %v3671_v41  ;;  %v4706_v41 = vld [vmem:[#allocation4 + $0x3b4] sm:$0xf0]  ;;  %v3211_v43 = vor.u32 %v4610_v34, %v3210_v33  ;;  %v3563_v14 = vor.u32 %v4698_v6, %v3562_v5  ;;  %v3418_v15 = vld [vmem:[#allocation4 + $0x248] sm:$0xf]  ;;  %v3247_v6 = vor.u32 %v4616_v56, %v3244_v57 }
  0x66   :  { %1424 = vmatpush.bf16.msra.mxu0 %v3399_v52  ;;  %v3595_v49 = vor.u32 %v4706_v41, %v3594_v40  ;;  %v4670_v52 = vld [vmem:[#allocation4 + $0x294] sm:$0xf0]  ;;  %v3546_v18 = vld [vmem:[#allocation4 + $0x348] sm:$0xf] }
  0x67   :  { %1438 = vmatpush.bf16.msra.mxu1 %v3527_v53  ;;  %v3339_v53 = vor.u32 %v4642_v45, %v3338_v44  ;;  %v3451_v62 = vor.u32 %v4670_v52, %v3450_v51  ;;  %v4634_v10 = vld [vmem:[#allocation4 + $0x174] sm:$0xf0]  ;;  %v3290_v21 = vld [vmem:[#allocation4 + $0x148] sm:$0xf] }
  0x68   :  { %1465 = vmatpush.bf16.msrb.mxu2 %v3799_v48  ;;  %v4606_v48 = vld [vmem:[#allocation4 + $0x94] sm:$0xf0]  ;;  %v3146_v24 = vld [vmem:[#allocation4 + $0x28] sm:$0xf] }
  0x69   :  { %1452 = vmatpush.bf16.msra.mxu3 %v3655_v59  ;;  %v3195_v58 = vor.u32 %v4606_v48, %v3194_v47  ;;  %v3322_v59 = vld [vmem:[#allocation4 + $0x188] sm:$0xf]  ;;  %v4630_v22 = vld [vmem:[#allocation4 + $0x154] sm:$0xf0] }
  0x6a   :  { %1425 = vmatpush.bf16.msra.mxu0 %v3383_v7  ;;  %v3323_v4 = vor.u32 %v4638_v61, %v3322_v59  ;;  %v3179_v7 = vor.u32 %v4602_v0, %v3178_v63  ;;  %v4594_v25 = vld [vmem:[#allocation4 + $0x34] sm:$0xf0]  ;;  %v3402_v27 = vld [vmem:[#allocation4 + $0x228] sm:$0xf] }
  0x6b   :  { %1439 = vmatpush.bf16.msra.mxu1 %v3511_v9  ;;  %v3306_v9 = vld [vmem:[#allocation4 + $0x168] sm:$0xf]  ;;  %v4658_v28 = vld [vmem:[#allocation4 + $0x234] sm:$0xf0] }
  0x6c   :  { %1466 = vmatpush.bf16.msrb.mxu2 %v3783_v3  ;;  %v4666_v3 = vld [vmem:[#allocation4 + $0x274] sm:$0xf0]  ;;  %v3307_v17 = vor.u32 %v4634_v10, %v3306_v9  ;;  %v3530_v30 = vld [vmem:[#allocation4 + $0x328] sm:$0xf]  ;;  %v3403_v36 = vor.u32 %v4658_v28, %v3402_v27  ;;  %v4612_v9 = vld [vmem:[#allocation4 + $0xcc] sm:$0xf] }
  0x6d   :  { %1453 = vmatpush.bf16.msra.mxu3 %v3639_v12  ;;  %1426 = vmatmul.bf16.vlgmr.msra.gmra.mxu0 %v5081_v54  ;;  %v3435_v11 = vor.u32 %v4666_v3, %v3434_v2  ;;  %v3162_v12 = vld [vmem:[#allocation4 + $0x48] sm:$0xf]  ;;  %v4690_v31 = vld [vmem:[#allocation4 + $0x334] sm:$0xf0]  ;;  %v4648_v3 = vld [vmem:[#allocation4 + $0x1ec] sm:$0xf] }
  0x6e   :  { %1516 = vmatpush.bf16.msrb.mxu0 %v3499_v19  ;;  %1440 = vmatmul.bf16.vlgmr.msra.gmra.mxu1 %v5085_v60  ;;  %v4694_v19 = vld [vmem:[#allocation4 + $0x354] sm:$0xf0]  ;;  %v3274_v33 = vld [vmem:[#allocation4 + $0x128] sm:$0xf]  ;;  %v3531_v41 = vor.u32 %v4690_v31, %v3530_v30  ;;  %v3228_v10 = vld [vmem:[#allocation4 + $0xd8] sm:$0xf0] }
  0x6f   :  { %1488 = vmatpush.bf16.msrb.mxu1 %v3243_v13  ;;  %v4598_v13 = vld [vmem:[#allocation4 + $0x54] sm:$0xf0]  ;;  %v3386_v44 = vld [vmem:[#allocation4 + $0x208] sm:$0xf]  ;;  %v3340_v30 = vld [vmem:[#allocation4 + $0x1b8] sm:$0xf0] }
  0x70   :  { %1467 = vmatpush.bf16.msrb.mxu2 %v3767_v20  ;;  %1454 = vmatmul.bf16.vlgmr.msra.gmra.mxu3 %v5121_v37  ;;  %v3163_v20 = vor.u32 %v4598_v13, %v3162_v12  ;;  %v4626_v34 = vld [vmem:[#allocation4 + $0x134] sm:$0xf0]  ;;  %v3882_v61 = vld [vmem:[#allocation4 + $0x5e8] sm:$0xf] }
  0x71   :  { %1481 = vmatpush.bf16.msrb.mxu3 %v3895_v16  ;;  %v4662_v16 = vld [vmem:[#allocation4 + $0x254] sm:$0xf0]  ;;  %v3275_v47 = vor.u32 %v4626_v34, %v3274_v33  ;;  %v3738_v63 = vld [vmem:[#allocation4 + $0x4c8] sm:$0xf]  ;;  %v4604_v33 = vld [vmem:[#allocation4 + $0x8c] sm:$0xf] }
  0x72   :  { %1517 = vmatpush.bf16.msrb.mxu0 %v3483_v32  ;;  %v3147_v32 = vor.u32 %v4594_v25, %v3146_v24  ;;  %v4590_v38 = vld [vmem:[#allocation4 + $0x14] sm:$0xf0]  ;;  %v3866_v13 = vld [vmem:[#allocation4 + $0x5c8] sm:$0xf]  ;;  %v3196_v34 = vld [vmem:[#allocation4 + $0x98] sm:$0xf0] }
  0x73   :  { %1489 = vmatpush.bf16.msrb.mxu1 %v3227_v29  ;;  %1468 = vmatmul.bf16.vlgmr.msrb.gmra.mxu2 %v5123_v42  ;;  %v3291_v29 = vor.u32 %v4630_v22, %v3290_v21  ;;  %v4746_v40 = vld [vmem:[#allocation4 + $0x4f4] sm:$0xf0]  ;;  %v4608_v21 = vld [vmem:[#allocation4 + $0xac] sm:$0xf]  ;;  %v3212_v22 = vld [vmem:[#allocation4 + $0xb8] sm:$0xf0] }
  0x74   :  { %1530 = vmatpush.bf16.msra.mxu2 %v3627_v23  ;;  %v3419_v23 = vor.u32 %v4662_v16, %v3418_v15  ;;  %v4654_v45 = vld [vmem:[#allocation4 + $0x214] sm:$0xf0]  ;;  %v3722_v15 = vld [vmem:[#allocation4 + $0x4a8] sm:$0xf]  ;;  %v3215_v31 = vor.u32 %v4608_v21, %v3212_v22  ;;  %v3276_v21 = vld [vmem:[#allocation4 + $0x138] sm:$0xf0] }
  0x75   :  { %1502 = vmatpush.bf16.msra.mxu3 %v3371_v26  ;;  %v3547_v26 = vor.u32 %v4694_v19, %v3546_v18  ;;  %v4686_v48 = vld [vmem:[#allocation4 + $0x314] sm:$0xf0]  ;;  %v3387_v59 = vor.u32 %v4654_v45, %v3386_v44  ;;  %v3356_v18 = vld [vmem:[#allocation4 + $0x1d8] sm:$0xf0]  ;;  %v3231_v19 = vor.u32 %v4612_v9, %v3228_v10  ;;  %v3850_v25 = vld [vmem:[#allocation4 + $0x5a8] sm:$0xf]  ;;  %v3199_v45 = vor.u32 %v4604_v33, %v3196_v34 }
  0x76   :  { %1518 = vmatpush.bf16.msrb.mxu0 %v3467_v46  ;;  %v3514_v46 = vld [vmem:[#allocation4 + $0x308] sm:$0xf]  ;;  %v4782_v51 = vld [vmem:[#allocation4 + $0x614] sm:$0xf0]  ;;  %v3324_v44 = vld [vmem:[#allocation4 + $0x198] sm:$0xf0] }
  0x77   :  { %1490 = vmatpush.bf16.msrb.mxu1 %v3211_v43  ;;  %v3258_v43 = vld [vmem:[#allocation4 + $0x108] sm:$0xf]  ;;  %v3515_v0 = vor.u32 %v4686_v48, %v3514_v46  ;;  %v4738_v16 = vld [vmem:[#allocation4 + $0x4b4] sm:$0xf0]  ;;  %v3180_v48 = vld [vmem:[#allocation4 + $0x78] sm:$0xf0] }
  0x78   :  { %1531 = vmatpush.bf16.msra.mxu2 %v3611_v35  ;;  %v3130_v35 = vld [vmem:[#allocation4 + $0x8] sm:$0xf]  ;;  %v4734_v28 = vld [vmem:[#allocation4 + $0x494] sm:$0xf0]  ;;  %v3292_v9 = vld [vmem:[#allocation4 + $0x158] sm:$0xf0] }
  0x79   :  { %1503 = vmatpush.bf16.msra.mxu3 %v3355_v39  ;;  %v3754_v39 = vld [vmem:[#allocation4 + $0x4e8] sm:$0xf]  ;;  %v3131_v52 = vor.u32 %v4590_v38, %v3130_v35  ;;  %v4726_v57 = vld [vmem:[#allocation4 + $0x454] sm:$0xf0]  ;;  %v3628_v33 = vld [vmem:[#allocation4 + $0x3f8] sm:$0xf0] }
  0x7a   :  { %1519 = vmatpush.bf16.msrb.mxu0 %v3451_v62  ;;  %v4778_v62 = vld [vmem:[#allocation4 + $0x5f4] sm:$0xf0]  ;;  %v3706_v27 = vld [vmem:[#allocation4 + $0x488] sm:$0xf] }
  0x7b   :  { %1491 = vmatpush.bf16.msrb.mxu1 %v3195_v58  ;;  %v3755_v58 = vor.u32 %v4746_v40, %v3754_v39  ;;  %v3707_v35 = vor.u32 %v4734_v28, %v3706_v27  ;;  %v3834_v38 = vld [vmem:[#allocation4 + $0x588] sm:$0xf]  ;;  %v4766_v39 = vld [vmem:[#allocation4 + $0x594] sm:$0xf0]  ;;  %v4588_v27 = vld [vmem:[#allocation4 + $0xc] sm:$0xf] }
  0x7c   :  { %1532 = vmatpush.bf16.msra.mxu2 %v3595_v49  ;;  %v3898_v49 = vld [vmem:[#allocation4 + $0x608] sm:$0xf]  ;;  %v3835_v46 = vor.u32 %v4766_v39, %v3834_v38  ;;  %v3132_v28 = vld [vmem:[#allocation4 + $0x18] sm:$0xf0]  ;;  %v4676_v38 = vld [vmem:[#allocation4 + $0x2cc] sm:$0xf] }
  0x7d   :  { %1504 = vmatpush.bf16.msra.mxu3 %v3339_v53  ;;  %v4622_v53 = vld [vmem:[#allocation4 + $0x114] sm:$0xf0]  ;;  %v3899_v2 = vor.u32 %v4782_v51, %v3898_v49  ;;  %v3690_v40 = vld [vmem:[#allocation4 + $0x468] sm:$0xf]  ;;  %v3135_v39 = vor.u32 %v4588_v27, %v3132_v28  ;;  %v3564_v28 = vld [vmem:[#allocation4 + $0x378] sm:$0xf0] }
  0x7e   :  { %1520 = vmatpush.bf16.msrb.mxu0 %v3435_v11  ;;  %v3259_v5 = vor.u32 %v4622_v53, %v3258_v43  ;;  %v4636_v43 = vld [vmem:[#allocation4 + $0x18c] sm:$0xf]  ;;  %v4762_v53 = vld [vmem:[#allocation4 + $0x574] sm:$0xf0]  ;;  %v3674_v56 = vld [vmem:[#allocation4 + $0x448] sm:$0xf] }
  0x7f   :  { %1492 = vmatpush.bf16.msrb.mxu1 %v3179_v7  ;;  %v3883_v7 = vor.u32 %v4778_v62, %v3882_v61  ;;  %v3327_v51 = vor.u32 %v4636_v43, %v3324_v44  ;;  %v3260_v43 = vld [vmem:[#allocation4 + $0x118] sm:$0xf0] }
  0x80   :  { %1533 = vmatpush.bf16.msra.mxu2 %v3579_v1  ;;  %3905 = vmatmul.msk.bf16.vlgmr.msrb.gmra.mxu3 %vm1288_vm0, %v5105_v50  ;;  %v4742_v1 = vld [vmem:[#allocation4 + $0x4d4] sm:$0xf0] }
  0x81   :  { %1505 = vmatpush.bf16.msra.mxu3 %v3323_v4  ;;  %v3372_v4 = vld [vmem:[#allocation4 + $0x1f8] sm:$0xf0]  ;;  %v3739_v11 = vor.u32 %v4742_v1, %v3738_v63  ;;  %v4596_v63 = vld [vmem:[#allocation4 + $0x4c] sm:$0xf]  ;;  %v3675_v1 = vor.u32 %v4726_v57, %v3674_v56 }
  0x82   :  { %1521 = vmatpush.bf16.msrb.mxu0 %v3419_v23  ;;  %v3375_v12 = vor.u32 %v4648_v3, %v3372_v4  ;;  %v3723_v23 = vor.u32 %v4738_v16, %v3722_v15  ;;  %v3802_v3 = vld [vmem:[#allocation4 + $0x548] sm:$0xf]  ;;  %v4758_v4 = vld [vmem:[#allocation4 + $0x554] sm:$0xf0]  ;;  %v4740_v56 = vld [vmem:[#allocation4 + $0x4cc] sm:$0xf] }
  0x83   :  { %1493 = vmatpush.bf16.msrb.mxu1 %v3163_v20  ;;  %v3786_v16 = vld [vmem:[#allocation4 + $0x528] sm:$0xf]  ;;  %v3740_v57 = vld [vmem:[#allocation4 + $0x4d8] sm:$0xf0] }
  0x84   :  { %1534 = vmatpush.bf16.msra.mxu2 %v3563_v14  ;;  %v4774_v14 = vld [vmem:[#allocation4 + $0x5d4] sm:$0xf0] }
  0x85   :  { %1506 = vmatpush.bf16.msra.mxu3 %v3307_v17  ;;  %v4644_v17 = vld [vmem:[#allocation4 + $0x1cc] sm:$0xf]  ;;  %v3867_v20 = vor.u32 %v4774_v14, %v3866_v13  ;;  %v3148_v13 = vld [vmem:[#allocation4 + $0x38] sm:$0xf0] }
  0x86   :  { %1522 = vmatpush.bf16.msrb.mxu0 %v3403_v36  ;;  %v3359_v24 = vor.u32 %v4644_v17, %v3356_v18  ;;  %v4754_v17 = vld [vmem:[#allocation4 + $0x534] sm:$0xf0]  ;;  %v3642_v18 = vld [vmem:[#allocation4 + $0x408] sm:$0xf] }
  0x87   :  { %1494 = vmatpush.bf16.msrb.mxu1 %v3147_v32 }
  0x88   :  { %1535 = vmatpush.bf16.msra.mxu2 %v3547_v26  ;;  %v4770_v26 = vld [vmem:[#allocation4 + $0x5b4] sm:$0xf0] }
  0x89   :  { %1507 = vmatpush.bf16.msra.mxu3 %v3291_v29  ;;  %v4640_v29 = vld [vmem:[#allocation4 + $0x1ac] sm:$0xf]  ;;  %v3851_v32 = vor.u32 %v4770_v26, %v3850_v25  ;;  %v3787_v25 = vor.u32 %v4754_v17, %v3786_v16  ;;  %v3770_v26 = vld [vmem:[#allocation4 + $0x508] sm:$0xf]  ;;  %v3580_v17 = vld [vmem:[#allocation4 + $0x398] sm:$0xf0] }
  0x8a   :  { %1523 = vmatpush.bf16.msrb.mxu0 %v3387_v59  ;;  %v3343_v36 = vor.u32 %v4640_v29, %v3340_v30  ;;  %v3308_v59 = vld [vmem:[#allocation4 + $0x178] sm:$0xf0] }
  0x8b   :  { %1495 = vmatpush.bf16.msrb.mxu1 %v3131_v52  ;;  %v3818_v52 = vld [vmem:[#allocation4 + $0x568] sm:$0xf] }
  0x8c   :  { %1536 = vmatpush.bf16.msra.mxu2 %v3531_v41  ;;  %v4730_v41 = vld [vmem:[#allocation4 + $0x474] sm:$0xf0]  ;;  %v3819_v62 = vor.u32 %v4762_v53, %v3818_v52  ;;  %v3612_v53 = vld [vmem:[#allocation4 + $0x3d8] sm:$0xf0] }
  0x8d   :  { %1508 = vmatpush.bf16.msra.mxu3 %v3275_v47  ;;  %1524 = vmatmul.bf16.vlgmr.msrb.gmra.mxu0 %v5081_v54  ;;  %v4600_v47 = vld [vmem:[#allocation4 + $0x6c] sm:$0xf]  ;;  %v3691_v49 = vor.u32 %v4730_v41, %v3690_v40  ;;  %v3484_v40 = vld [vmem:[#allocation4 + $0x2d8] sm:$0xf0] }
  0x8e   :  { %1579 = vmatpush.bf16.msra.mxu0 %v3899_v2  ;;  %1496 = vmatmul.bf16.vlgmr.msrb.gmra.mxu1 %v5083_v55  ;;  %v3183_v61 = vor.u32 %v4600_v47, %v3180_v48  ;;  %v4620_v41 = vld [vmem:[#allocation4 + $0x10c] sm:$0xf] }
  0x8f   :  { %1544 = vmatpush.bf16.msra.mxu1 %v3755_v58  ;;  %v4632_v58 = vld [vmem:[#allocation4 + $0x16c] sm:$0xf]  ;;  %v3263_v52 = vor.u32 %v4620_v41, %v3260_v43  ;;  %v3676_v43 = vld [vmem:[#allocation4 + $0x458] sm:$0xf0] }
  0x90   :  { %1537 = vmatpush.bf16.msra.mxu2 %v3515_v0  ;;  %v3164_v0 = vld [vmem:[#allocation4 + $0x58] sm:$0xf0]  ;;  %v3311_v2 = vor.u32 %v4632_v58, %v3308_v59  ;;  %v4672_v59 = vld [vmem:[#allocation4 + $0x2ac] sm:$0xf] }
  0x91   :  { %1509 = vmatpush.bf16.msra.mxu3 %v3259_v5  ;;  %v3658_v5 = vld [vmem:[#allocation4 + $0x428] sm:$0xf]  ;;  %v3167_v10 = vor.u32 %v4596_v63, %v3164_v0  ;;  %v3868_v63 = vld [vmem:[#allocation4 + $0x5d8] sm:$0xf0]  ;;  %v4724_v41 = vld [vmem:[#allocation4 + $0x44c] sm:$0xf] }
  0x92   :  { %1600 = vmatpush.bf16.msrb.mxu0 %v3375_v12  ;;  %v4592_v12 = vld [vmem:[#allocation4 + $0x2c] sm:$0xf] }
  0x93   :  { %1545 = vmatpush.bf16.msra.mxu1 %v3739_v11  ;;  %1538 = vmatmul.bf16.vlgmr.msra.gmra.mxu2 %v5085_v60  ;;  %v3803_v11 = vor.u32 %v4758_v4, %v3802_v3  ;;  %v3151_v22 = vor.u32 %v4592_v12, %v3148_v13  ;;  %v3596_v4 = vld [vmem:[#allocation4 + $0x3b8] sm:$0xf0] }
  0x94   :  { %1586 = vmatpush.bf16.msrb.mxu2 %v3247_v6  ;;  %1510 = vmatmul.bf16.vlgmr.msra.gmra.mxu3 %v5095_v8  ;;  %v4722_v6 = vld [vmem:[#allocation4 + $0x434] sm:$0xf0]  ;;  %v3852_v12 = vld [vmem:[#allocation4 + $0x5b8] sm:$0xf0] }
  0x95   :  { %1558 = vmatpush.bf16.msrb.mxu3 %v3883_v7  ;;  %v4628_v7 = vld [vmem:[#allocation4 + $0x14c] sm:$0xf]  ;;  %v3659_v14 = vor.u32 %v4722_v6, %v3658_v5  ;;  %v3724_v6 = vld [vmem:[#allocation4 + $0x4b8] sm:$0xf0] }
  0x96   :  { %1601 = vmatpush.bf16.msrb.mxu0 %v3359_v24  ;;  %v3295_v15 = vor.u32 %v4628_v7, %v3292_v9  ;;  %v3500_v24 = vld [vmem:[#allocation4 + $0x2f8] sm:$0xf0]  ;;  %v4736_v5 = vld [vmem:[#allocation4 + $0x4ac] sm:$0xf] }
  0x97   :  { %1546 = vmatpush.bf16.msra.mxu1 %v3723_v23  ;;  %v4680_v23 = vld [vmem:[#allocation4 + $0x2ec] sm:$0xf] }
  0x98   :  { %1587 = vmatpush.bf16.msrb.mxu2 %v3231_v19  ;;  %v4718_v19 = vld [vmem:[#allocation4 + $0x414] sm:$0xf0]  ;;  %v3503_v34 = vor.u32 %v4680_v23, %v3500_v24  ;;  %v4668_v9 = vld [vmem:[#allocation4 + $0x28c] sm:$0xf] }
  0x99   :  { %1559 = vmatpush.bf16.msrb.mxu3 %v3867_v20  ;;  %v4624_v20 = vld [vmem:[#allocation4 + $0x12c] sm:$0xf]  ;;  %v3643_v29 = vor.u32 %v4718_v19, %v3642_v18  ;;  %v3708_v19 = vld [vmem:[#allocation4 + $0x498] sm:$0xf0] }
  0x9a   :  { %1602 = vmatpush.bf16.msrb.mxu0 %v3343_v36  ;;  %v3279_v30 = vor.u32 %v4624_v20, %v3276_v21  ;;  %v3756_v36 = vld [vmem:[#allocation4 + $0x4f8] sm:$0xf0]  ;;  %v4732_v18 = vld [vmem:[#allocation4 + $0x48c] sm:$0xf] }
  0x9b   :  { %1547 = vmatpush.bf16.msra.mxu1 %v3707_v35  ;;  %v4744_v35 = vld [vmem:[#allocation4 + $0x4ec] sm:$0xf] }
  0x9c   :  { %1588 = vmatpush.bf16.msrb.mxu2 %v3215_v31  ;;  %v4750_v31 = vld [vmem:[#allocation4 + $0x514] sm:$0xf0]  ;;  %v3759_v48 = vor.u32 %v4744_v35, %v3756_v36  ;;  %v4664_v21 = vld [vmem:[#allocation4 + $0x26c] sm:$0xf] }
  0x9d   :  { %1560 = vmatpush.bf16.msrb.mxu3 %v3851_v32  ;;  %3906 = vmatmul.msk.bf16.vlgmr.msra.gmra.mxu0 %vm1288_vm0, %v5105_v50  ;;  %v4712_v32 = vld [vmem:[#allocation4 + $0x3ec] sm:$0xf]  ;;  %v3771_v44 = vor.u32 %v4750_v31, %v3770_v26 }
  0x9e   :  { %1603 = vmatpush.bf16.msrb.mxu0 %v3327_v51  ;;  %v3631_v47 = vor.u32 %v4712_v32, %v3628_v33  ;;  %v3487_v51 = vor.u32 %v4676_v38, %v3484_v40  ;;  %v4764_v23 = vld [vmem:[#allocation4 + $0x58c] sm:$0xf]  ;;  %v3548_v40 = vld [vmem:[#allocation4 + $0x358] sm:$0xf0] }
  0x9f   :  { %1548 = vmatpush.bf16.msra.mxu1 %v3691_v49  ;;  %v4708_v49 = vld [vmem:[#allocation4 + $0x3cc] sm:$0xf] }
  0xa0   :  { %1589 = vmatpush.bf16.msrb.mxu2 %v3199_v45  ;;  %v4776_v45 = vld [vmem:[#allocation4 + $0x5ec] sm:$0xf]  ;;  %v3615_v0 = vor.u32 %v4708_v49, %v3612_v53 }
  0xa1   :  { %1561 = vmatpush.bf16.msrb.mxu3 %v3835_v46  ;;  %v3884_v46 = vld [vmem:[#allocation4 + $0x5f8] sm:$0xf0]  ;;  %v4696_v26 = vld [vmem:[#allocation4 + $0x36c] sm:$0xf] }
  0xa2   :  { %1604 = vmatpush.bf16.msrb.mxu0 %v3311_v2  ;;  %v3887_v58 = vor.u32 %v4776_v45, %v3884_v46  ;;  %v4704_v2 = vld [vmem:[#allocation4 + $0x3ac] sm:$0xf]  ;;  %v3567_v35 = vor.u32 %v4696_v26, %v3564_v28  ;;  %v3404_v46 = vld [vmem:[#allocation4 + $0x238] sm:$0xf0]  ;;  %v4150_v26 = vld [vmem:[#allocation6 + $0x1c0] sm:$0xf] }
  0xa3   :  { %1549 = vmatpush.bf16.msra.mxu1 %v3675_v1  ;;  %v3743_v1 = vor.u32 %v4740_v56, %v3740_v57  ;;  %v3599_v13 = vor.u32 %v4704_v2, %v3596_v4  ;;  %v4660_v32 = vld [vmem:[#allocation4 + $0x24c] sm:$0xf]  ;;  %v3532_v56 = vld [vmem:[#allocation4 + $0x338] sm:$0xf0] }
  0xa4   :  { %1590 = vmatpush.bf16.msrb.mxu2 %v3183_v61  ;;  %v3468_v61 = vld [vmem:[#allocation4 + $0x2b8] sm:$0xf0]  ;;  %v4760_v33 = vld [vmem:[#allocation4 + $0x56c] sm:$0xf] }
  0xa5   :  { %1562 = vmatpush.bf16.msrb.mxu3 %v3819_v62  ;;  %v4772_v62 = vld [vmem:[#allocation4 + $0x5cc] sm:$0xf]  ;;  %v3471_v3 = vor.u32 %v4672_v59, %v3468_v61  ;;  %v3900_v2 = vld [vmem:[#allocation4 + $0x618] sm:$0xf0] }
  0xa6   :  { %1605 = vmatpush.bf16.msrb.mxu0 %v3295_v15  ;;  %v3871_v7 = vor.u32 %v4772_v62, %v3868_v63  ;;  %v4700_v15 = vld [vmem:[#allocation4 + $0x38c] sm:$0xf]  ;;  %v3388_v62 = vld [vmem:[#allocation4 + $0x218] sm:$0xf0] }
  0xa7   :  { %1550 = vmatpush.bf16.msra.mxu1 %v3659_v14  ;;  %v3727_v14 = vor.u32 %v4736_v5, %v3724_v6  ;;  %v3583_v24 = vor.u32 %v4700_v15, %v3580_v17  ;;  %v4692_v38 = vld [vmem:[#allocation4 + $0x34c] sm:$0xf]  ;;  %v4817_v15 = vld [vmem:[#allocation6 + $0xec] sm:$0xf0]  ;;  %v4166_v17 = vld [vmem:[#allocation6 + $0x1e0] sm:$0xf] }
  0xa8   :  { %1591 = vmatpush.bf16.msrb.mxu2 %v3167_v10  ;;  %v3452_v10 = vld [vmem:[#allocation4 + $0x298] sm:$0xf0]  ;;  %v4656_v45 = vld [vmem:[#allocation4 + $0x22c] sm:$0xf]  ;;  %v3551_v49 = vor.u32 %v4692_v38, %v3548_v40  ;;  %v4118_v38 = vld [vmem:[#allocation6 + $0x180] sm:$0xf] }
  0xa9   :  { %1563 = vmatpush.bf16.msrb.mxu3 %v3803_v11  ;;  %v4768_v11 = vld [vmem:[#allocation4 + $0x5ac] sm:$0xf]  ;;  %v3455_v16 = vor.u32 %v4668_v9, %v3452_v10  ;;  %v3407_v53 = vor.u32 %v4656_v45, %v3404_v46  ;;  %v3644_v10 = vld [vmem:[#allocation4 + $0x418] sm:$0xf0]  ;;  %v4833_v45 = vld [vmem:[#allocation6 + $0x16c] sm:$0xf0] }
  0xaa   :  { %1606 = vmatpush.bf16.msrb.mxu0 %v3279_v30  ;;  %v3855_v20 = vor.u32 %v4768_v11, %v3852_v12  ;;  %v3692_v30 = vld [vmem:[#allocation4 + $0x478] sm:$0xf0]  ;;  %v4720_v57 = vld [vmem:[#allocation4 + $0x42c] sm:$0xf] }
  0xab   :  { %1551 = vmatpush.bf16.msra.mxu1 %v3643_v29  ;;  %v4728_v29 = vld [vmem:[#allocation4 + $0x46c] sm:$0xf] }
  0xac   :  { %1592 = vmatpush.bf16.msrb.mxu2 %v3151_v22  ;;  %v3436_v22 = vld [vmem:[#allocation4 + $0x278] sm:$0xf0]  ;;  %v3695_v36 = vor.u32 %v4728_v29, %v3692_v30  ;;  %v4652_v61 = vld [vmem:[#allocation4 + $0x20c] sm:$0xf]  ;;  %v4006_v30 = vld [vmem:[#allocation6 + $0xa0] sm:$0xf] }
  0xad   :  { %1564 = vmatpush.bf16.msrb.mxu3 %v3787_v25  ;;  %v3711_v25 = vor.u32 %v4732_v18, %v3708_v19  ;;  %v3439_v27 = vor.u32 %v4664_v21, %v3436_v22  ;;  %v4752_v63 = vld [vmem:[#allocation4 + $0x52c] sm:$0xf]  ;;  %v3391_v6 = vor.u32 %v4652_v61, %v3388_v62  ;;  %v4849_v18 = vld [vmem:[#allocation6 + $0x1ec] sm:$0xf0]  ;;  %v3942_v62 = vld [vmem:[#allocation6 + $0x20] sm:$0xf] }
  0xae   :  { %1552 = vmatmul.bf16.vlgmr.msra.gmra.mxu1 %v5121_v37  ;;  %1607 = vmatpush.bf16.msrb.mxu0 %v3263_v52  ;;  %v4688_v52 = vld [vmem:[#allocation4 + $0x32c] sm:$0xf] }
  0xaf   :  { %1614 = vmatpush.bf16.msrb.mxu1 %v3503_v34  ;;  %v3820_v34 = vld [vmem:[#allocation4 + $0x578] sm:$0xf0]  ;;  %v4684_v5 = vld [vmem:[#allocation4 + $0x30c] sm:$0xf] }
  0xb0   :  { %1593 = vmatpush.bf16.msrb.mxu2 %v3135_v39  ;;  %v4716_v9 = vld [vmem:[#allocation4 + $0x40c] sm:$0xf] }
  0xb1   :  { %1565 = vmatpush.bf16.msrb.mxu3 %v3771_v44  ;;  %1608 = vmatmul.bf16.vlgmr.msrb.gmra.mxu0 %v5095_v8  ;;  %v3420_v8 = vld [vmem:[#allocation4 + $0x258] sm:$0xf0]  ;;  %v3823_v44 = vor.u32 %v4760_v33, %v3820_v34  ;;  %v4748_v12 = vld [vmem:[#allocation4 + $0x50c] sm:$0xf]  ;;  %v3990_v34 = vld [vmem:[#allocation6 + $0x80] sm:$0xf]  ;;  %v5157_v46 = vpop.f32.mrf.mxu1 }
  0xb2   :  { %1656 = vmatpush.bf16.msra.mxu0 %v3887_v58  ;;  %v3423_v39 = vor.u32 %v4660_v32, %v3420_v8  ;;  %v3660_v58 = vld [vmem:[#allocation4 + $0x438] sm:$0xf0]  ;;  %v5145_v22 = vpop.f32.mrf.mxu2  ;;  %v4134_v32 = vld [vmem:[#allocation6 + $0x1a0] sm:$0xf]  ;;  %v4841_v8 = vld [vmem:[#allocation6 + $0x1ac] sm:$0xf0] }
  0xb3   :  { %1615 = vmatpush.bf16.msrb.mxu1 %v3487_v51  ;;  %1594 = vmatmul.bf16.vlgmr.msrb.gmra.mxu2 %v5083_v55  ;;  %v3836_v55 = vld [vmem:[#allocation4 + $0x598] sm:$0xf0]  ;;  %v3679_v51 = vor.u32 %v4724_v41, %v3676_v43  ;;  %v3663_v4 = vor.u32 %v4720_v57, %v3660_v58  ;;  %v5153_v40 = vpop.f32.mrf.mxu3  ;;  %v3974_v43 = vld [vmem:[#allocation6 + $0x60] sm:$0xf] }
  0xb4   :  { %1642 = vmatpush.bf16.msra.mxu2 %v3759_v48  ;;  %1566 = vmatmul.bf16.vlgmr.msrb.gmra.mxu3 %v5123_v42  ;;  %v3839_v31 = vor.u32 %v4764_v23, %v3836_v55  ;;  %v3804_v48 = vld [vmem:[#allocation4 + $0x558] sm:$0xf0]  ;;  %v4167_v55 = vor.u32 %v4849_v18, %v4166_v17 }
  0xb5   :  { %1628 = vmatpush.bf16.msra.mxu3 %v3631_v47  ;;  %v4756_v47 = vld [vmem:[#allocation4 + $0x54c] sm:$0xf] }
  0xb6   :  { %1657 = vmatpush.bf16.msra.mxu0 %v3871_v7  ;;  %v3807_v59 = vor.u32 %v4756_v47, %v3804_v48  ;;  %v3516_v7 = vld [vmem:[#allocation4 + $0x318] sm:$0xf0] }
  0xb7   :  { %1616 = vmatpush.bf16.msrb.mxu1 %v3471_v3  ;;  %v3535_v3 = vor.u32 %v4688_v52, %v3532_v56  ;;  %v3519_v19 = vor.u32 %v4684_v5, %v3516_v7  ;;  %v4086_v52 = vld [vmem:[#allocation6 + $0x140] sm:$0xf]  ;;  %v4821_v7 = vld [vmem:[#allocation6 + $0x10c] sm:$0xf0] }
  0xb8   :  { %1643 = vmatpush.bf16.msra.mxu2 %v3743_v1  ;;  %v4780_v1 = vld [vmem:[#allocation4 + $0x60c] sm:$0xf]  ;;  %v3926_v5 = vld [vmem:[#allocation6] sm:$0xf] }
  0xb9   :  { %1629 = vmatpush.bf16.msra.mxu3 %v3615_v0  ;;  %v3788_v0 = vld [vmem:[#allocation4 + $0x538] sm:$0xf0] }
  0xba   :  { %1658 = vmatpush.bf16.msra.mxu0 %v3855_v20  ;;  %v3791_v11 = vor.u32 %v4752_v63, %v3788_v0  ;;  %v3647_v20 = vor.u32 %v4716_v9, %v3644_v10  ;;  %v5155_v41 = vpop.f32.mrf.mxu2  ;;  %v4793_v63 = vld [vmem:[#allocation6 + $0x2c] sm:$0xf0]  ;;  %v4070_v0 = vld [vmem:[#allocation6 + $0x120] sm:$0xf]  ;;  %v4815_v9 = vld [vmem:[#allocation6 + $0xe4] sm:$0xf] }
  0xbb   :  { %1617 = vmatpush.bf16.msrb.mxu1 %v3455_v16  ;;  %v3772_v16 = vld [vmem:[#allocation4 + $0x518] sm:$0xf0]  ;;  %v4040_v10 = vld [vmem:[#allocation6 + $0xf0] sm:$0xf0] }
  0xbc   :  { %1644 = vmatpush.bf16.msra.mxu2 %v3727_v14  ;;  %v4038_v14 = vld [vmem:[#allocation6 + $0xe0] sm:$0xf]  ;;  %v3775_v23 = vor.u32 %v4748_v12, %v3772_v16  ;;  %v4168_v12 = vld [vmem:[#allocation6 + $0x1f0] sm:$0xf0]  ;;  %v4043_v18 = vor.u32 %v4815_v9, %v4040_v10  ;;  %v4791_v10 = vld [vmem:[#allocation6 + $0x24] sm:$0xf] }
  0xbd   :  { %1630 = vmatpush.bf16.msra.mxu3 %v3599_v13  ;;  %v3903_v13 = vor.u32 %v4780_v1, %v3900_v2  ;;  %v4039_v21 = vor.u32 %v4817_v15, %v4038_v14  ;;  %v4825_v1 = vld [vmem:[#allocation6 + $0x12c] sm:$0xf0]  ;;  %v3943_v2 = vor.u32 %v4793_v63, %v3942_v62  ;;  %v3960_v63 = vld [vmem:[#allocation6 + $0x50] sm:$0xf0] }
  0xbe   :  { %1659 = vmatpush.bf16.msra.mxu0 %v3839_v31  ;;  %v4809_v31 = vld [vmem:[#allocation6 + $0xac] sm:$0xf0] }
  0xbf   :  { %1618 = vmatpush.bf16.msrb.mxu1 %v3439_v27  ;;  %v4845_v27 = vld [vmem:[#allocation6 + $0x1cc] sm:$0xf0]  ;;  %v4007_v33 = vor.u32 %v4809_v31, %v4006_v30  ;;  %v4839_v30 = vld [vmem:[#allocation6 + $0x1a4] sm:$0xf]  ;;  %v4136_v31 = vld [vmem:[#allocation6 + $0x1b0] sm:$0xf0] }
  0xc0   :  { %1645 = vmatpush.bf16.msra.mxu2 %v3711_v25  ;;  %v4813_v25 = vld [vmem:[#allocation6 + $0xcc] sm:$0xf0]  ;;  %v4151_v29 = vor.u32 %v4845_v27, %v4150_v26 }
  0xc1   :  { %1631 = vmatpush.bf16.msra.mxu3 %v3583_v24  ;;  %v4022_v24 = vld [vmem:[#allocation6 + $0xc0] sm:$0xf] }
  0xc2   :  { %1660 = vmatpush.bf16.msra.mxu0 %v3823_v44  ;;  %v4023_v28 = vor.u32 %v4813_v25, %v4022_v24  ;;  %v4102_v44 = vld [vmem:[#allocation6 + $0x160] sm:$0xf]  ;;  %v5159_v56 = vpop.f32.mrf.mxu2 }
  0xc3   :  { %1619 = vmatpush.bf16.msrb.mxu1 %v3423_v39  ;;  %v4837_v39 = vld [vmem:[#allocation6 + $0x18c] sm:$0xf0]  ;;  %v4103_v48 = vor.u32 %v4833_v45, %v4102_v44  ;;  %v5176_v24 = vld [vmem:[%s5392_s2] sm:$0xf] }
  0xc4   :  { %1646 = vmatpush.bf16.msra.mxu2 %v3695_v36  ;;  %v5151_v36 = vpop.f32.mrf.mxu0  ;;  %v266_v44 = vperm.slane %v5176_v24, 1 }
  0xc5   :  { %1632 = vmatpush.bf16.msra.mxu3 %v3567_v35  ;;  %v4805_v35 = vld [vmem:[#allocation6 + $0x8c] sm:$0xf0] }
  0xc6   :  { %1661 = vmatpush.bf16.msra.mxu0 %v3807_v59  ;;  %v5165_v59 = vpop.f32.mrf.mxu3 }
  0xc7   :  { %1620 = vmatpush.bf16.msrb.mxu1 %v3407_v53  ;;  %v4829_v53 = vld [vmem:[#allocation6 + $0x14c] sm:$0xf0] }
  0xc8   :  { %1647 = vmatpush.bf16.msra.mxu2 %v3679_v51  ;;  %v4797_v51 = vld [vmem:[#allocation6 + $0x4c] sm:$0xf0]  ;;  %v4087_v61 = vor.u32 %v4829_v53, %v4086_v52  ;;  %v4104_v52 = vld [vmem:[#allocation6 + $0x170] sm:$0xf0] }
  0xc9   :  { %1633 = vmatpush.bf16.msra.mxu3 %v3551_v49  ;;  %v3958_v49 = vld [vmem:[#allocation6 + $0x40] sm:$0xf] }
  0xca   :  { %1662 = vmatpush.bf16.msra.mxu0 %v3791_v11  ;;  %v3959_v58 = vor.u32 %v4797_v51, %v3958_v49  ;;  %v4847_v11 = vld [vmem:[#allocation6 + $0x1e4] sm:$0xf]  ;;  %v5171_v15 = vpop.f32.mrf.mxu2 }
  0xcb   :  { %1621 = vmatpush.bf16.msrb.mxu1 %v3391_v6  ;;  %v4054_v6 = vld [vmem:[#allocation6 + $0x100] sm:$0xf]  ;;  %v4831_v51 = vld [vmem:[#allocation6 + $0x164] sm:$0xf] }
  0xcc   :  { %1648 = vmatpush.bf16.msra.mxu2 %v3663_v4  ;;  %v5163_v57 = vpop.f32.mrf.mxu0  ;;  %v4071_v4 = vor.u32 %v4825_v1, %v4070_v0  ;;  %v4055_v17 = vor.u32 %v4821_v7, %v4054_v6  ;;  %v4107_v62 = vor.u32 %v4831_v51, %v4104_v52 }
  0xcd   :  { %1634 = vmatpush.bf16.msra.mxu3 %v3535_v3  ;;  %v5167_v3 = vpop.f32.mrf.mxu1 }
  0xce   :  { %1622 = vmatmul.bf16.vlgmr.msrb.gmra.mxu1 %v5081_v54  ;;  %1663 = vmatpush.bf16.msra.mxu0 %v3775_v23  ;;  %v4135_v54 = vor.u32 %v4841_v8, %v4134_v32  ;;  %v4843_v23 = vld [vmem:[#allocation6 + $0x1c4] sm:$0xf]  ;;  %v265_v32 = vperm.slane %v5176_v24, 0 }
  0xcf   :  { %1677 = vmatpush.bf16.msra.mxu1 %v3903_v13 }
  0xd0   :  { %1649 = vmatpush.bf16.msra.mxu2 %v3647_v20  ;;  %v4811_v20 = vld [vmem:[#allocation6 + $0xc4] sm:$0xf] }
  0xd1   :  { %1635 = vmatpush.bf16.msra.mxu3 %v3519_v19  ;;  %1664 = vmatmul.bf16.vlgmr.msra.gmra.mxu0 %v5123_v42  ;;  %v4801_v42 = vld [vmem:[#allocation6 + $0x6c] sm:$0xf0]  ;;  %v4171_v19 = vor.u32 %v4847_v11, %v4168_v12  ;;  %v3944_v11 = vld [vmem:[#allocation6 + $0x30] sm:$0xf0] }
  0xd2   :  { %v3975_v47 = vor.u32 %v4801_v42, %v3974_v43  ;;  %v1302_v43 = vadd.f32 %v5151_v36, %v265_v32  ;;  %v4795_v36 = vld [vmem:[#allocation6 + $0x44] sm:$0xf] }
  0xd3   :  { %2516 = vmatpush.bf16.msrb.mxu1 %v4167_v55  ;;  %1650 = vmatmul.bf16.vlgmr.msra.gmra.mxu2 %v5121_v37  ;;  %v4119_v37 = vor.u32 %v4837_v39, %v4118_v38  ;;  %v1399_v16 = vpop.f32.mrf.mxu3  ;;  %v4152_v55 = vld [vmem:[#allocation6 + $0x1d0] sm:$0xf0]  ;;  %v3963_v7 = vor.u32 %v4795_v36, %v3960_v63  ;;  %v4881_v36 = vld [vmem:[#allocation6 + $0x2ec] sm:$0xf0]  ;;  %v4422_v63 = vld [vmem:[#allocation6 + $0x3e0] sm:$0xf] }
  0xd4   :  { %1636 = vmatmul.bf16.vlgmr.msra.gmra.mxu3 %v5085_v60  ;;  %v3991_v60 = vor.u32 %v4805_v35, %v3990_v34  ;;  %v5169_v13 = vpop.f32.mrf.mxu0  ;;  %v4155_v27 = vor.u32 %v4843_v23, %v4152_v55  ;;  %v4803_v34 = vld [vmem:[#allocation6 + $0x84] sm:$0xf]  ;;  %v3992_v35 = vld [vmem:[#allocation6 + $0x90] sm:$0xf0]  ;;  %v1316_v53 = vadd.f32 %v5157_v46, %v1302_v43 }
  0xd5   :  { %2502 = vmatpush.bf16.msrb.mxu3 %v4039_v21  ;;  %v4024_v21 = vld [vmem:[#allocation6 + $0xd0] sm:$0xf0]  ;;  %v5178_v25 = vpop.f32.mrf.mxu1  ;;  %v3995_v42 = vor.u32 %v4803_v34, %v3992_v35  ;;  %v4787_v23 = vld [vmem:[#allocation6 + $0x4] sm:$0xf] }
  0xd6   :  { %v4027_v26 = vor.u32 %v4811_v20, %v4024_v21  ;;  %v1413_v38 = vpop.f32.mrf.mxu2  ;;  %v3928_v55 = vld [vmem:[#allocation6 + $0x10] sm:$0xf0] }
  0xd7   :  { %2517 = vmatpush.bf16.msrb.mxu1 %v4151_v29  ;;  %v4008_v29 = vld [vmem:[#allocation6 + $0xb0] sm:$0xf0] }
  0xd9   :  { %2503 = vmatpush.bf16.msrb.mxu3 %v4023_v28  ;;  %v4807_v28 = vld [vmem:[#allocation6 + $0xa4] sm:$0xf] }
  0xda   :  { %v4011_v8 = vor.u32 %v4807_v28, %v4008_v29  ;;  %v4056_v28 = vld [vmem:[#allocation6 + $0x110] sm:$0xf0] }
  0xdb   :  { %2518 = vmatpush.bf16.msrb.mxu1 %v4135_v54  ;;  %v4139_v54 = vor.u32 %v4839_v30, %v4136_v31  ;;  %v1401_v39 = vpop.f32.mrf.mxu3 }
  0xdc   :  { %v1402_v20 = vadd.f32 %v1401_v39, %v266_v44 }
  0xdd   :  { %2504 = vmatpush.bf16.msrb.mxu3 %v4007_v33  ;;  %v5181_v33 = vpop.f32.mrf.mxu0  ;;  %v5185_v49 = vpop.f32.mrf.mxu1 }
  0xde   :  { %3907 = vmatmul.msk.bf16.vlgmr.msra.gmra.mxu1 %vm1288_vm0, %v5105_v50  ;;  %v4789_v50 = vld [vmem:[#allocation6 + $0xc] sm:$0xf0]  ;;  %v1415_v6 = vpop.f32.mrf.mxu2 }
  0xdf   :  { %2519 = vmatpush.bf16.msrb.mxu1 %v4119_v37  ;;  %v3927_v14 = vor.u32 %v4789_v50, %v3926_v5  ;;  %v4120_v37 = vld [vmem:[#allocation6 + $0x190] sm:$0xf0]  ;;  %v1330_v5 = vadd.f32 %v5145_v22, %v1316_v53  ;;  %v1304_v50 = vadd.f32 %v5163_v57, %v265_v32  ;;  %v3947_v22 = vor.u32 %v4791_v10, %v3944_v11  ;;  %v4909_v10 = vld [vmem:[#allocation6 + $0x3cc] sm:$0xf0] }
  0xe1   :  { %2505 = vmatpush.bf16.msrb.mxu3 %v3991_v60  ;;  %v4835_v60 = vld [vmem:[#allocation6 + $0x184] sm:$0xf] }
  0xe2   :  { %v4123_v45 = vor.u32 %v4835_v60, %v4120_v37 }
  0xe3   :  { %2520 = vmatpush.bf16.msrb.mxu1 %v4103_v48  ;;  %v3976_v48 = vld [vmem:[#allocation6 + $0x70] sm:$0xf0] }
  0xe5   :  { %2506 = vmatpush.bf16.msrb.mxu3 %v3975_v47  ;;  %v4799_v47 = vld [vmem:[#allocation6 + $0x64] sm:$0xf] }
  0xe7   :  { %2521 = vmatpush.bf16.msrb.mxu1 %v4087_v61  ;;  %v1400_v61 = vadd.f32 %v1399_v16, %v266_v44  ;;  %v4072_v16 = vld [vmem:[#allocation6 + $0x130] sm:$0xf0] }
  0xe9   :  { %2507 = vmatpush.bf16.msrb.mxu3 %v3959_v58  ;;  %v3979_v58 = vor.u32 %v4799_v47, %v3976_v48  ;;  %v1414_v9 = vadd.f32 %v1413_v38, %v1400_v61 }
  0xea   :  { %v1427_v0 = vpop.f32.mrf.mxu0 }
  0xeb   :  { %2522 = vmatpush.bf16.msrb.mxu1 %v4071_v4  ;;  %v4088_v4 = vld [vmem:[#allocation6 + $0x150] sm:$0xf0]  ;;  %v1441_v12 = vpop.f32.mrf.mxu1 }
  0xed   :  { %2508 = vmatpush.bf16.msrb.mxu3 %v3943_v2  ;;  %v4827_v2 = vld [vmem:[#allocation6 + $0x144] sm:$0xf] }
  0xee   :  { %v4091_v46 = vor.u32 %v4827_v2, %v4088_v4  ;;  %v4818_v2 = vld [vmem:[#allocation6 + $0xf4] sm:$0xf0] }
  0xef   :  { %2523 = vmatpush.bf16.msrb.mxu1 %v4055_v17  ;;  %v1344_v17 = vadd.f32 %v5153_v40, %v1330_v5 }
  0xf1   :  { %2509 = vmatpush.bf16.msrb.mxu3 %v3927_v14  ;;  %v4823_v14 = vld [vmem:[#allocation6 + $0x124] sm:$0xf]  ;;  %v1358_v57 = vadd.f32 %v5169_v13, %v1344_v17  ;;  %v4814_v17 = vld [vmem:[#allocation6 + $0xd4] sm:$0xf0] }
  0xf2   :  { %v4075_v21 = vor.u32 %v4823_v14, %v4072_v16  ;;  %v1429_v31 = vpop.f32.mrf.mxu0  ;;  %v4030_v16 = vld [vmem:[#allocation6 + $0xc8] sm:$0xf] }
  0xf3   :  { %2572 = vmatpush.bf16.msra.mxu1 %v4171_v19  ;;  %v1455_v1 = vpop.f32.mrf.mxu3  ;;  %v1428_v19 = vadd.f32 %v1427_v0, %v1414_v9  ;;  %v1372_v32 = vadd.f32 %v5178_v25, %v1358_v57  ;;  %v1443_v38 = vpop.f32.mrf.mxu1  ;;  %v4850_v9 = vld [vmem:[#allocation6 + $0x1f4] sm:$0xf0] }
  0xf5   :  { %2558 = vmatpush.bf16.msra.mxu3 %v4043_v18  ;;  %v1318_v18 = vadd.f32 %v5167_v3, %v1304_v50  ;;  %v1442_v30 = vadd.f32 %v1441_v12, %v1428_v19  ;;  %v3931_v3 = vor.u32 %v4787_v23, %v3928_v55  ;;  %v1386_v39 = vadd.f32 %v5159_v56, %v1372_v32  ;;  %v4877_v50 = vld [vmem:[#allocation6 + $0x2cc] sm:$0xf0]  ;;  %v4846_v19 = vld [vmem:[#allocation6 + $0x1d4] sm:$0xf0]  ;;  %v4262_v23 = vld [vmem:[#allocation6 + $0x2a0] sm:$0xf] }
  0xf6   :  { %v1469_v40 = vpop.f32.mrf.mxu2  ;;  %v4031_v32 = vor.u32 %v4814_v17, %v4030_v16  ;;  %v4326_v16 = vld [vmem:[#allocation6 + $0x320] sm:$0xf] }
  0xf7   :  { %2573 = vmatpush.bf16.msra.mxu1 %v4155_v27  ;;  %v4819_v27 = vld [vmem:[#allocation6 + $0x104] sm:$0xf]  ;;  %v1332_v29 = vadd.f32 %v5155_v41, %v1318_v18  ;;  %v1684_v44 = vmax.f32 %v1386_v39, 0.0  ;;  %v4158_v18 = vld [vmem:[#allocation6 + $0x1c8] sm:$0xf] }
  0xf8   :  { %v4059_v13 = vor.u32 %v4819_v27, %v4056_v28  ;;  %v4873_v27 = vld [vmem:[#allocation6 + $0x2ac] sm:$0xf0]  ;;  %v4390_v28 = vld [vmem:[#allocation6 + $0x3a0] sm:$0xf] }
  0xf9   :  { %2559 = vmatpush.bf16.msra.mxu3 %v4027_v26  ;;  %v1346_v34 = vadd.f32 %v5165_v59, %v1332_v29  ;;  %v4905_v29 = vld [vmem:[#allocation6 + $0x3ac] sm:$0xf0]  ;;  %v4374_v39 = vld [vmem:[#allocation6 + $0x380] sm:$0xf] }
  0xfb   :  { %2574 = vmatpush.bf16.msra.mxu1 %v4139_v54  ;;  %v1457_v26 = vpop.f32.mrf.mxu3  ;;  %v1456_v54 = vadd.f32 %v1455_v1, %v1442_v30  ;;  %v1360_v41 = vadd.f32 %v5181_v33, %v1346_v34  ;;  %v4913_v1 = vld [vmem:[#allocation6 + $0x3ec] sm:$0xf0]  ;;  %v4263_v30 = vor.u32 %v4873_v27, %v4262_v23  ;;  %v3950_v23 = vld [vmem:[#allocation6 + $0x28] sm:$0xf]  ;;  %v4794_v27 = vld [vmem:[#allocation6 + $0x34] sm:$0xf0] }
  0xfc   :  { %v4423_v4 = vor.u32 %v4913_v1, %v4422_v63  ;;  %v4869_v34 = vld [vmem:[#allocation6 + $0x28c] sm:$0xf0]  ;;  %v4214_v63 = vld [vmem:[#allocation6 + $0x240] sm:$0xf] }
  0xfd   :  { %2560 = vmatpush.bf16.msra.mxu3 %v4011_v8  ;;  %v1416_v8 = vadd.f32 %v1415_v6, %v1402_v20  ;;  %v1470_v60 = vadd.f32 %v1469_v40, %v1456_v54  ;;  %v1374_v25 = vadd.f32 %v5185_v49, %v1360_v41  ;;  %v4046_v49 = vld [vmem:[#allocation6 + $0xe8] sm:$0xf]  ;;  %v4406_v6 = vld [vmem:[#allocation6 + $0x3c0] sm:$0xf]  ;;  %v4901_v41 = vld [vmem:[#allocation6 + $0x38c] sm:$0xf0] }
  0xfe   :  { %v1471_v48 = vpop.f32.mrf.mxu2  ;;  %2544 = vmatpush.bf16.msrb.mxu0 %v4423_v4  ;;  %v4407_v11 = vor.u32 %v4909_v10, %v4406_v6  ;;  %v4047_v20 = vor.u32 %v4818_v2, %v4046_v49  ;;  %v4014_v40 = vld [vmem:[#allocation6 + $0xa8] sm:$0xf]  ;;  %v4342_v1 = vld [vmem:[#allocation6 + $0x340] sm:$0xf]  ;;  %v4834_v2 = vld [vmem:[#allocation6 + $0x174] sm:$0xf0] }
  0xff   :  { %2575 = vmatpush.bf16.msra.mxu1 %v4123_v45  ;;  %v1430_v35 = vadd.f32 %v1429_v31, %v1416_v8  ;;  %v1388_v59 = vadd.f32 %v5171_v15, %v1374_v25  ;;  %v4278_v15 = vld [vmem:[#allocation6 + $0x2c0] sm:$0xf]  ;;  %v4391_v31 = vor.u32 %v4905_v29, %v4390_v28  ;;  %v4159_v8 = vor.u32 %v4846_v19, %v4158_v18  ;;  %v4142_v54 = vld [vmem:[#allocation6 + $0x1a8] sm:$0xf]  ;;  %v4826_v29 = vld [vmem:[#allocation6 + $0x134] sm:$0xf0] }
 0x100   :  { %v4110_v49 = vld [vmem:[#allocation6 + $0x168] sm:$0xf] }
 0x101   :  { %2561 = vmatpush.bf16.msra.mxu3 %v3995_v42  ;;  %v1444_v43 = vadd.f32 %v1443_v38, %v1430_v35  ;;  %v4842_v35 = vld [vmem:[#allocation6 + $0x1b4] sm:$0xf0]  ;;  %v4094_v19 = vld [vmem:[#allocation6 + $0x148] sm:$0xf] }
 0x102   :  { %2545 = vmatpush.bf16.msrb.mxu0 %v4407_v11  ;;  %v4111_v11 = vor.u32 %v4834_v2, %v4110_v49  ;;  %v4078_v28 = vld [vmem:[#allocation6 + $0x128] sm:$0xf] }
 0x103   :  { %2576 = vmatpush.bf16.msra.mxu1 %v4107_v62  ;;  %v1483_v37 = vpop.f32.mrf.mxu3  ;;  %v1458_v45 = vadd.f32 %v1457_v26, %v1444_v43  ;;  %v4294_v62 = vld [vmem:[#allocation6 + $0x2e0] sm:$0xf] }
 0x104   :  { %v1484_v42 = vadd.f32 %v1483_v37, %v1470_v60  ;;  %v4295_v0 = vor.u32 %v4881_v36, %v4294_v62  ;;  %v4375_v37 = vor.u32 %v4901_v41, %v4374_v39  ;;  %v4911_v39 = vld [vmem:[#allocation6 + $0x3e4] sm:$0xf]  ;;  %v4424_v41 = vld [vmem:[#allocation6 + $0x3f0] sm:$0xf0] }
 0x105   :  { %2562 = vmatpush.bf16.msra.mxu3 %v3979_v58  ;;  %v1472_v52 = vadd.f32 %v1471_v48, %v1458_v45  ;;  %v1688_v58 = vmax.f32 %v1388_v59, 0.0  ;;  %v4143_v45 = vor.u32 %v4842_v35, %v4142_v54  ;;  %v4865_v48 = vld [vmem:[#allocation6 + $0x26c] sm:$0xf0]  ;;  %v4126_v59 = vld [vmem:[#allocation6 + $0x188] sm:$0xf] }
 0x106   :  { %v1685_v47 = vmax.f32 %v1484_v42, 0.0  ;;  %2530 = vmatpush.bf16.msrb.mxu2 %v4295_v0  ;;  %2546 = vmatpush.bf16.msrb.mxu0 %v4391_v31  ;;  %v3998_v42 = vld [vmem:[#allocation6 + $0x88] sm:$0xf]  ;;  %v4861_v0 = vld [vmem:[#allocation6 + $0x24c] sm:$0xf0] }
 0x107   :  { %2577 = vmatpush.bf16.msra.mxu1 %v4091_v46  ;;  %v4279_v46 = vor.u32 %v4877_v50, %v4278_v15  ;;  %v4215_v4 = vor.u32 %v4861_v0, %v4214_v63  ;;  %v4893_v15 = vld [vmem:[#allocation6 + $0x34c] sm:$0xf0]  ;;  %v4408_v0 = vld [vmem:[#allocation6 + $0x3d0] sm:$0xf0] }
 0x108   :  { %v1692_v51 = vpack.c.bf16 %v1685_v47, %v1684_v44  ;;  %v4806_v44 = vld [vmem:[#allocation6 + $0x94] sm:$0xf0]  ;;  %v4230_v47 = vld [vmem:[#allocation6 + $0x260] sm:$0xf]  ;;  %v4343_v6 = vor.u32 %v4893_v15, %v4342_v1  ;;  %v4885_v54 = vld [vmem:[#allocation6 + $0x30c] sm:$0xf0] }
 0x109   :  { %2563 = vmatpush.bf16.msra.mxu3 %v3963_v7  ;;  %v4174_v7 = vld [vmem:[#allocation6 + $0x1e8] sm:$0xf]  ;;  %v3999_v62 = vor.u32 %v4806_v44, %v3998_v42  ;;  %v4790_v42 = vld [vmem:[#allocation6 + $0x14] sm:$0xf0]  ;;  %v4812_v15 = vld [vmem:[#allocation6 + $0xcc] sm:$0xf] }
 0x10a   :  { %1696 = vst [vmem:[#allocation2] sm:$0xff] %v1692_v51  ;;  %v5200_v5 = vpop.f32.mrf.mxu0  ;;  %2531 = vmatpush.bf16.msrb.mxu2 %v4279_v46  ;;  %v4358_v51 = vld [vmem:[#allocation6 + $0x360] sm:$0xf]  ;;  %2547 = vmatpush.bf16.msrb.mxu0 %v4375_v37  ;;  %v3934_v37 = vld [vmem:[#allocation6 + $0x8] sm:$0xf] }
 0x10b   :  { %2578 = vmatpush.bf16.msra.mxu1 %v4075_v21  ;;  %v1485_v53 = vpop.f32.mrf.mxu3  ;;  %v4175_v21 = vor.u32 %v4850_v9, %v4174_v7  ;;  %v5210_v43 = vpop.f32.mrf.mxu1  ;;  %v3966_v7 = vld [vmem:[#allocation6 + $0x48] sm:$0xf]  ;;  %v4798_v9 = vld [vmem:[#allocation6 + $0x54] sm:$0xf0]  ;;  %v3935_v2 = vor.u32 %v4790_v42, %v3934_v37 }
 0x10c   :  { %v1486_v56 = vadd.f32 %v1485_v53, %v1472_v52  ;;  %v4838_v52 = vld [vmem:[#allocation6 + $0x194] sm:$0xf0]  ;;  %v4231_v53 = vor.u32 %v4865_v48, %v4230_v47  ;;  %v4062_v44 = vld [vmem:[#allocation6 + $0x108] sm:$0xf]  ;;  %v3951_v47 = vor.u32 %v4794_v27, %v3950_v23  ;;  %v4079_v48 = vor.u32 %v4826_v29, %v4078_v28  ;;  %v4016_v23 = vld [vmem:[#allocation6 + $0xb8] sm:$0xf0] }
 0x10d   :  { %2564 = vmatpush.bf16.msra.mxu3 %v3947_v22  ;;  %v4127_v36 = vor.u32 %v4838_v52, %v4126_v59  ;;  %v4816_v59 = vld [vmem:[#allocation6 + $0xec] sm:$0xf]  ;;  %v4048_v52 = vld [vmem:[#allocation6 + $0xf8] sm:$0xf0]  ;;  %v4867_v29 = vld [vmem:[#allocation6 + $0x284] sm:$0xf] }
 0x10e   :  { %v1689_v33 = vmax.f32 %v1486_v56, 0.0  ;;  %2532 = vmatpush.bf16.msrb.mxu2 %v4263_v30  ;;  %v4897_v56 = vld [vmem:[#allocation6 + $0x36c] sm:$0xf0]  ;;  %v3967_v30 = vor.u32 %v4798_v9, %v3966_v7  ;;  %v4051_v7 = vor.u32 %v4816_v59, %v4048_v52  ;;  %v4128_v59 = vld [vmem:[#allocation6 + $0x198] sm:$0xf0] }
 0x10f   :  { %2579 = vmatpush.bf16.msra.mxu1 %v4059_v13  ;;  %v4246_v13 = vld [vmem:[#allocation6 + $0x280] sm:$0xf] }
 0x110   :  { %v1694_v61 = vpack.c.bf16 %v1689_v33, %v1688_v58  ;;  %v4247_v38 = vor.u32 %v4869_v34, %v4246_v13  ;;  %v4359_v58 = vor.u32 %v4897_v56, %v4358_v51  ;;  %v3982_v33 = vld [vmem:[#allocation6 + $0x68] sm:$0xf]  ;;  %v4879_v13 = vld [vmem:[#allocation6 + $0x2e4] sm:$0xf]  ;;  %v4296_v34 = vld [vmem:[#allocation6 + $0x2f0] sm:$0xf0] }
 0x111   :  { %2565 = vmatpush.bf16.msra.mxu3 %v3931_v3  ;;  %v3910_v12 = vld [vmem:[#allocation2] sm:$0xf]  ;;  %v4783_v14 = vld [vmem:[#allocation2 + $0x4] sm:$0xf]  ;;  %v4810_v3 = vld [vmem:[#allocation6 + $0xb4] sm:$0xf0] }
 0x112   :  { %1698 = vst [vmem:[#allocation2 + $0x10] sm:$0xff] %v1694_v61  ;;  %v5208_v60 = vpop.f32.mrf.mxu0  ;;  %v4015_v25 = vor.u32 %v4810_v3, %v4014_v40  ;;  %2533 = vmatpush.bf16.msrb.mxu2 %v4247_v38  ;;  %v4802_v61 = vld [vmem:[#allocation6 + $0x74] sm:$0xf0]  ;;  %2548 = vmatpush.bf16.msrb.mxu0 %v4359_v58  ;;  %v4182_v40 = vld [vmem:[#allocation6 + $0x200] sm:$0xf]  ;;  %v4299_v38 = vor.u32 %v4879_v13, %v4296_v34 }
 0x113   :  { %v3983_v10 = vor.u32 %v4802_v61, %v3982_v33  ;;  %v5218_v18 = vpop.f32.mrf.mxu1  ;;  %v4853_v3 = vld [vmem:[#allocation6 + $0x20c] sm:$0xf0]  ;;  %v4822_v51 = vld [vmem:[#allocation6 + $0x114] sm:$0xf0]  ;;  %v4875_v56 = vld [vmem:[#allocation6 + $0x2c4] sm:$0xf] }
 0x114   :  { %v4280_v58 = vld [vmem:[#allocation6 + $0x2d0] sm:$0xf0]  ;;  %v4907_v33 = vld [vmem:[#allocation6 + $0x3c4] sm:$0xf] }
 0x115   :  { %v4283_v63 = vor.u32 %v4875_v56, %v4280_v58  ;;  %v4411_v49 = vor.u32 %v4907_v33, %v4408_v0  ;;  %v4376_v13 = vld [vmem:[#allocation6 + $0x390] sm:$0xf0]  ;;  %v268_v58 = vperm.slane %v5176_v24, 3 }
 0x116   :  { %2534 = vmatpush.bf16.msrb.mxu2 %v4231_v53  ;;  %v5216_v17 = vpop.f32.mrf.mxu2  ;;  %2549 = vmatpush.bf16.msrb.mxu0 %v4343_v6  ;;  %v4032_v6 = vld [vmem:[#allocation6 + $0xd8] sm:$0xf0]  ;;  %v4360_v56 = vld [vmem:[#allocation6 + $0x370] sm:$0xf0] }
 0x117   :  { %v5214_v46 = vpop.f32.mrf.mxu3  ;;  %v4035_v27 = vor.u32 %v4812_v15, %v4032_v6  ;;  %v4891_v15 = vld [vmem:[#allocation6 + $0x344] sm:$0xf]  ;;  %v4112_v6 = vld [vmem:[#allocation6 + $0x178] sm:$0xf0] }
 0x119   :  { %v4785_v22 = vld [vmem:[#allocation2 + $0xc] sm:$0xf0]  ;;  %v3912_v57 = vld [vmem:[#allocation2 + $0x10] sm:$0xf0] }
 0x11a   :  { %v5202_v55 = vor.u32 %v4785_v22, %v3910_v12  ;;  %v5204_v26 = vor.u32 %v4783_v14, %v3912_v57  ;;  %v5212_v50 = vpop.f32.mrf.mxu0  ;;  %v4198_v12 = vld [vmem:[#allocation6 + $0x220] sm:$0xf]  ;;  %v4857_v14 = vld [vmem:[#allocation6 + $0x22c] sm:$0xf0]  ;;  %v4830_v22 = vld [vmem:[#allocation6 + $0x154] sm:$0xf0]  ;;  %2535 = vmatpush.bf16.msrb.mxu2 %v4215_v4  ;;  %v4063_v4 = vor.u32 %v4822_v51, %v4062_v44 }
 0x11b   :  { %v4199_v57 = vor.u32 %v4857_v14, %v4198_v12  ;;  %v4095_v31 = vor.u32 %v4830_v22, %v4094_v19  ;;  %v4903_v12 = vld [vmem:[#allocation6 + $0x3a4] sm:$0xf]  ;;  %v4844_v14 = vld [vmem:[#allocation6 + $0x1cc] sm:$0xf]  ;;  %v4392_v22 = vld [vmem:[#allocation6 + $0x3b0] sm:$0xf0] }
 0x11c   :  { %2510 = vmatmul.bf16.vlgmr.msrb.gmra.mxu3 %v5202_v55  ;;  %2524 = vmatmul.bf16.vlgmr.msrb.gmra.mxu1 %v5204_v26  ;;  %v4836_v51 = vld [vmem:[#allocation6 + $0x18c] sm:$0xf] }
 0x11d   :  { %2614 = vmatpush.bf16.msrb.mxu3 %v4047_v20  ;;  %2628 = vmatpush.bf16.msrb.mxu1 %v4175_v21  ;;  %v4889_v20 = vld [vmem:[#allocation6 + $0x32c] sm:$0xf0] }
 0x11e   :  { %v4327_v21 = vor.u32 %v4889_v20, %v4326_v16  ;;  %2536 = vmatpush.bf16.msrb.mxu2 %v4199_v57  ;;  %v5228_v1 = vpop.f32.mrf.mxu2  ;;  %v4160_v16 = vld [vmem:[#allocation6 + $0x1d8] sm:$0xf0]  ;;  %v4395_v57 = vor.u32 %v4903_v12, %v4392_v22  ;;  %v267_v20 = vperm.slane %v5176_v24, 2 }
 0x11f   :  { %v5226_v61 = vpop.f32.mrf.mxu3  ;;  %v4163_v28 = vor.u32 %v4844_v14, %v4160_v16  ;;  %v4200_v16 = vld [vmem:[#allocation6 + $0x230] sm:$0xf0] }
 0x120   :  { %2550 = vmatpush.bf16.msrb.mxu0 %v4327_v21  ;;  %v4808_v21 = vld [vmem:[#allocation6 + $0xac] sm:$0xf]  ;;  %v1498_v37 = vadd.f32 %v5210_v43, %v267_v20 }
 0x121   :  { %2615 = vmatpush.bf16.msrb.mxu3 %v4031_v32  ;;  %2629 = vmatpush.bf16.msrb.mxu1 %v4159_v8  ;;  %v4310_v32 = vld [vmem:[#allocation6 + $0x300] sm:$0xf]  ;;  %v4183_v8 = vor.u32 %v4853_v3, %v4182_v40  ;;  %v4019_v42 = vor.u32 %v4808_v21, %v4016_v23 }
 0x122   :  { %v4311_v35 = vor.u32 %v4885_v54, %v4310_v32  ;;  %v4840_v32 = vld [vmem:[#allocation6 + $0x1ac] sm:$0xf]  ;;  %v1512_v43 = vadd.f32 %v5214_v46, %v1498_v37  ;;  %v4887_v46 = vld [vmem:[#allocation6 + $0x324] sm:$0xf] }
 0x123   :  { %2537 = vmatpush.bf16.msrb.mxu2 %v4183_v8  ;;  %v4144_v8 = vld [vmem:[#allocation6 + $0x1b8] sm:$0xf0] }
 0x124   :  { %2551 = vmatpush.bf16.msrb.mxu0 %v4311_v35  ;;  %v4147_v44 = vor.u32 %v4840_v32, %v4144_v8  ;;  %v1526_v21 = vadd.f32 %v5200_v5, %v1512_v43  ;;  %v4828_v32 = vld [vmem:[#allocation6 + $0x14c] sm:$0xf]  ;;  %v4096_v8 = vld [vmem:[#allocation6 + $0x158] sm:$0xf0] }
 0x125   :  { %2616 = vmatpush.bf16.msrb.mxu3 %v4015_v25  ;;  %2630 = vmatpush.bf16.msrb.mxu1 %v4143_v45  ;;  %v4427_v25 = vor.u32 %v4911_v39, %v4424_v41  ;;  %v5222_v45 = vpop.f32.mrf.mxu0  ;;  %v4804_v39 = vld [vmem:[#allocation6 + $0x8c] sm:$0xf]  ;;  %v4000_v41 = vld [vmem:[#allocation6 + $0x98] sm:$0xf0] }
 0x126   :  { %v4003_v0 = vor.u32 %v4804_v39, %v4000_v41  ;;  %v4883_v39 = vld [vmem:[#allocation6 + $0x304] sm:$0xf]  ;;  %v4312_v41 = vld [vmem:[#allocation6 + $0x310] sm:$0xf0]  ;;  %v1540_v37 = vadd.f32 %v5216_v17, %v1526_v21  ;;  %v4788_v43 = vld [vmem:[#allocation6 + $0xc] sm:$0xf] }
 0x127   :  { %2586 = vmatpush.bf16.msra.mxu2 %v4299_v38 }
 0x128   :  { %2600 = vmatpush.bf16.msra.mxu0 %v4427_v25  ;;  %v4863_v25 = vld [vmem:[#allocation6 + $0x264] sm:$0xf] }
 0x129   :  { %2617 = vmatpush.bf16.msrb.mxu3 %v3999_v62  ;;  %2631 = vmatpush.bf16.msrb.mxu1 %v4127_v36  ;;  %v4848_v62 = vld [vmem:[#allocation6 + $0x1ec] sm:$0xf]  ;;  %v4176_v36 = vld [vmem:[#allocation6 + $0x1f8] sm:$0xf0] }
 0x12a   :  { %v4179_v9 = vor.u32 %v4848_v62, %v4176_v36  ;;  %v4800_v62 = vld [vmem:[#allocation6 + $0x6c] sm:$0xf]  ;;  %v3984_v36 = vld [vmem:[#allocation6 + $0x78] sm:$0xf0] }
 0x12b   :  { %v5224_v53 = vpop.f32.mrf.mxu1  ;;  %2587 = vmatpush.bf16.msra.mxu2 %v4283_v63  ;;  %v4832_v63 = vld [vmem:[#allocation6 + $0x16c] sm:$0xf] }
 0x12c   :  { %2566 = vmatmul.bf16.vlgmr.msra.gmra.mxu3 %v5202_v55  ;;  %2580 = vmatmul.bf16.vlgmr.msra.gmra.mxu1 %v5204_v26 }
 0x12d   :  { %2618 = vmatpush.bf16.msrb.mxu3 %v3983_v10  ;;  %2632 = vmatpush.bf16.msrb.mxu1 %v4111_v11  ;;  %v4871_v10 = vld [vmem:[#allocation6 + $0x2a4] sm:$0xf]  ;;  %v4264_v11 = vld [vmem:[#allocation6 + $0x2b0] sm:$0xf0] }
 0x12e   :  { %2601 = vmatpush.bf16.msra.mxu0 %v4411_v49  ;;  %v4267_v19 = vor.u32 %v4871_v10, %v4264_v11  ;;  %v5233_v3 = vpop.f32.mrf.mxu0  ;;  %v4131_v49 = vor.u32 %v4836_v51, %v4128_v59  ;;  %v4855_v10 = vld [vmem:[#allocation6 + $0x224] sm:$0xf]  ;;  %v4315_v59 = vor.u32 %v4883_v39, %v4312_v41 }
 0x130   :  { %2588 = vmatpush.bf16.msra.mxu2 %v4267_v19  ;;  %v4328_v19 = vld [vmem:[#allocation6 + $0x330] sm:$0xf0] }
 0x131   :  { %2619 = vmatpush.bf16.msrb.mxu3 %v3967_v30  ;;  %2633 = vmatpush.bf16.msrb.mxu1 %v4095_v31  ;;  %v4248_v30 = vld [vmem:[#allocation6 + $0x290] sm:$0xf0]  ;;  %v4899_v31 = vld [vmem:[#allocation6 + $0x384] sm:$0xf] }
 0x132   :  { %2602 = vmatpush.bf16.msra.mxu0 %v4395_v57  ;;  %v4251_v54 = vor.u32 %v4867_v29, %v4248_v30  ;;  %v4379_v38 = vor.u32 %v4899_v31, %v4376_v13  ;;  %v4796_v29 = vld [vmem:[#allocation6 + $0x4c] sm:$0xf]  ;;  %v3968_v30 = vld [vmem:[#allocation6 + $0x58] sm:$0xf0]  ;;  %v1500_v31 = vadd.f32 %v5218_v18, %v267_v20  ;;  %v4331_v13 = vor.u32 %v4887_v46, %v4328_v19 }
 0x133   :  { %v5235_v34 = vpop.f32.mrf.mxu1  ;;  %v3952_v18 = vld [vmem:[#allocation6 + $0x38] sm:$0xf0] }
 0x134   :  { %2589 = vmatpush.bf16.msra.mxu2 %v4251_v54  ;;  %v4203_v54 = vor.u32 %v4855_v10, %v4200_v16  ;;  %v1514_v20 = vadd.f32 %v5226_v61, %v1500_v31 }
 0x135   :  { %2620 = vmatpush.bf16.msrb.mxu3 %v3951_v47  ;;  %2634 = vmatpush.bf16.msrb.mxu1 %v4079_v48  ;;  %v4232_v47 = vld [vmem:[#allocation6 + $0x270] sm:$0xf0]  ;;  %v4895_v48 = vld [vmem:[#allocation6 + $0x364] sm:$0xf] }
 0x136   :  { %v1595_v35 = vpop.f32.mrf.mxu2  ;;  %2603 = vmatpush.bf16.msra.mxu0 %v4379_v38  ;;  %v4235_v52 = vor.u32 %v4863_v25, %v4232_v47  ;;  %v4363_v33 = vor.u32 %v4895_v48, %v4360_v56  ;;  %v1611_v57 = vpop.f32.mrf.mxu0  ;;  %v4184_v38 = vld [vmem:[#allocation6 + $0x210] sm:$0xf0]  ;;  %v4792_v25 = vld [vmem:[#allocation6 + $0x2c] sm:$0xf]  ;;  %v4080_v48 = vld [vmem:[#allocation6 + $0x138] sm:$0xf0]  ;;  %v1554_v56 = vadd.f32 %v5224_v53, %v1540_v37 }
 0x137   :  { %v5231_v40 = vpop.f32.mrf.mxu3  ;;  %v1596_v11 = vadd.f32 %v1595_v35, %v268_v58  ;;  %v4851_v35 = vld [vmem:[#allocation6 + $0x204] sm:$0xf]  ;;  %v4824_v47 = vld [vmem:[#allocation6 + $0x12c] sm:$0xf]  ;;  %v3955_v17 = vor.u32 %v4792_v25, %v3952_v18  ;;  %v4414_v25 = vld [vmem:[#allocation6 + $0x3c8] sm:$0xf] }
 0x138   :  { %2590 = vmatpush.bf16.msra.mxu2 %v4235_v52  ;;  %v4187_v51 = vor.u32 %v4851_v35, %v4184_v38  ;;  %v4083_v61 = vor.u32 %v4824_v47, %v4080_v48  ;;  %v4914_v35 = vld [vmem:[#allocation6 + $0x3f4] sm:$0xf0]  ;;  %v4286_v38 = vld [vmem:[#allocation6 + $0x2c8] sm:$0xf] }
 0x139   :  { %2621 = vmatpush.bf16.msrb.mxu3 %v3935_v2  ;;  %2635 = vmatpush.bf16.msrb.mxu1 %v4063_v4  ;;  %v4859_v2 = vld [vmem:[#allocation6 + $0x244] sm:$0xf]  ;;  %v4216_v4 = vld [vmem:[#allocation6 + $0x250] sm:$0xf0]  ;;  %v1610_v5 = vadd.f32 %v5233_v3, %v1596_v11  ;;  %v4910_v18 = vld [vmem:[#allocation6 + $0x3d4] sm:$0xf0] }
 0x13a   :  { %2604 = vmatpush.bf16.msra.mxu0 %v4363_v33  ;;  %v4415_v47 = vor.u32 %v4910_v18, %v4414_v25  ;;  %v4270_v48 = vld [vmem:[#allocation6 + $0x2a8] sm:$0xf] }
 0x13c   :  { %2622 = vmatmul.bf16.vlgmr.msrb.gmra.mxu3 %v5202_v55  ;;  %2636 = vmatmul.bf16.vlgmr.msrb.gmra.mxu1 %v5204_v26 }
 0x13d   :  { %2670 = vmatpush.bf16.msra.mxu3 %v4051_v7  ;;  %2684 = vmatpush.bf16.msra.mxu1 %v4179_v9  ;;  %v4219_v7 = vor.u32 %v4859_v2, %v4216_v4  ;;  %v4344_v9 = vld [vmem:[#allocation6 + $0x350] sm:$0xf0]  ;;  %v1568_v2 = vadd.f32 %v5231_v40, %v1554_v56 }
 0x13e   :  { %v4347_v14 = vor.u32 %v4891_v15, %v4344_v9  ;;  %v1597_v23 = vpop.f32.mrf.mxu2  ;;  %v4820_v15 = vld [vmem:[#allocation6 + $0x10c] sm:$0xf] }
 0x13f   :  { %v5246_v22 = vpop.f32.mrf.mxu3  ;;  %2591 = vmatpush.bf16.msra.mxu2 %v4219_v7  ;;  %v1582_v11 = vadd.f32 %v5212_v50, %v1568_v2  ;;  %v4898_v2 = vld [vmem:[#allocation6 + $0x374] sm:$0xf0] }
 0x140   :  { %2605 = vmatpush.bf16.msra.mxu0 %v4347_v14 }
 0x141   :  { %2671 = vmatpush.bf16.msra.mxu3 %v4035_v27  ;;  %2685 = vmatpush.bf16.msra.mxu1 %v4163_v28  ;;  %v3987_v27 = vor.u32 %v4800_v62, %v3984_v36  ;;  %v4115_v28 = vor.u32 %v4832_v63, %v4112_v6  ;;  %v1598_v62 = vadd.f32 %v1597_v23, %v268_v58  ;;  %v4064_v6 = vld [vmem:[#allocation6 + $0x118] sm:$0xf0]  ;;  %v1686_v19 = vmax.f32 %v1582_v11, 0.0  ;;  %v4858_v11 = vld [vmem:[#allocation6 + $0x234] sm:$0xf0] }
 0x142   :  { %v4067_v9 = vor.u32 %v4820_v15, %v4064_v6  ;;  %v4222_v6 = vld [vmem:[#allocation6 + $0x248] sm:$0xf] }
 0x143   :  { %2592 = vmatpush.bf16.msra.mxu2 %v4203_v54  ;;  %v1612_v24 = vadd.f32 %v1611_v57, %v1598_v62  ;;  %v4882_v54 = vld [vmem:[#allocation6 + $0x2f4] sm:$0xf0]  ;;  %v4382_v62 = vld [vmem:[#allocation6 + $0x388] sm:$0xf] }
 0x144   :  { %2606 = vmatpush.bf16.msra.mxu0 %v4331_v13  ;;  %v4430_v13 = vld [vmem:[#allocation6 + $0x3e8] sm:$0xf] }
 0x145   :  { %2672 = vmatpush.bf16.msra.mxu3 %v4019_v42  ;;  %2686 = vmatpush.bf16.msra.mxu1 %v4147_v44  ;;  %v3971_v42 = vor.u32 %v4796_v29, %v3968_v30  ;;  %v4099_v44 = vor.u32 %v4828_v32, %v4096_v8  ;;  %v4431_v37 = vor.u32 %v4914_v35, %v4430_v13  ;;  %v4872_v13 = vld [vmem:[#allocation6 + $0x2ac] sm:$0xf]  ;;  %v4272_v35 = vld [vmem:[#allocation6 + $0x2b8] sm:$0xf0] }
 0x147   :  { %2593 = vmatpush.bf16.msra.mxu2 %v4187_v51  ;;  %v4874_v51 = vld [vmem:[#allocation6 + $0x2b4] sm:$0xf0] }
 0x148   :  { %2607 = vmatpush.bf16.msra.mxu0 %v4315_v59  ;;  %v4398_v59 = vld [vmem:[#allocation6 + $0x3a8] sm:$0xf] }
 0x149   :  { %2673 = vmatpush.bf16.msra.mxu3 %v4003_v0  ;;  %2687 = vmatpush.bf16.msra.mxu1 %v4131_v49  ;;  %v3936_v0 = vld [vmem:[#allocation6 + $0x18] sm:$0xf0]  ;;  %v1528_v49 = vadd.f32 %v5208_v60, %v1514_v20 }
 0x14a   :  { %v3939_v7 = vor.u32 %v4788_v43, %v3936_v0  ;;  %v4238_v43 = vld [vmem:[#allocation6 + $0x268] sm:$0xf]  ;;  %v4866_v0 = vld [vmem:[#allocation6 + $0x274] sm:$0xf0] }
 0x14b   :  { %v1623_v12 = vpop.f32.mrf.mxu1  ;;  %v1542_v10 = vadd.f32 %v5228_v1, %v1528_v49  ;;  %v4366_v49 = vld [vmem:[#allocation6 + $0x368] sm:$0xf] }
 0x14c   :  { %v1624_v3 = vadd.f32 %v1623_v12, %v1610_v5  ;;  %v4367_v15 = vor.u32 %v4898_v2, %v4366_v49 }
 0x14d   :  { %2674 = vmatpush.bf16.msra.mxu3 %v3987_v27  ;;  %2688 = vmatpush.bf16.msra.mxu1 %v4115_v28  ;;  %v1556_v40 = vadd.f32 %v5235_v34, %v1542_v10  ;;  %v4206_v10 = vld [vmem:[#allocation6 + $0x228] sm:$0xf] }
 0x14e   :  { %v1665_v4 = vpop.f32.mrf.mxu0 }
 0x14f   :  { %v1570_v57 = vadd.f32 %v5246_v22, %v1556_v40  ;;  %v4302_v22 = vld [vmem:[#allocation6 + $0x2e8] sm:$0xf]  ;;  %v4207_v40 = vor.u32 %v4858_v11, %v4206_v10  ;;  %v4925_v10 = vld [vmem:[%s5395_s5 + $0x30] sm:$0xff] }
 0x151   :  { %2675 = vmatpush.bf16.msra.mxu3 %v3971_v42  ;;  %2689 = vmatpush.bf16.msra.mxu1 %v4099_v44  ;;  %v1584_v1 = vadd.f32 %v5222_v45, %v1570_v57  ;;  %v4878_v44 = vld [vmem:[#allocation6 + $0x2d4] sm:$0xf0] }
 0x152   :  { %v4287_v20 = vor.u32 %v4878_v44, %v4286_v38  ;;  %v4886_v57 = vld [vmem:[#allocation6 + $0x314] sm:$0xf0]  ;;  %v4400_v38 = vld [vmem:[#allocation6 + $0x3b8] sm:$0xf0] }
 0x153   :  { %v1625_v52 = vpop.f32.mrf.mxu1  ;;  %v1690_v31 = vmax.f32 %v1584_v1, 0.0  ;;  %v4384_v44 = vld [vmem:[#allocation6 + $0x398] sm:$0xf0] }
 0x154   :  { %v1626_v12 = vadd.f32 %v1625_v52, %v1612_v24  ;;  %v4271_v52 = vor.u32 %v4874_v51, %v4270_v48  ;;  %v4894_v24 = vld [vmem:[#allocation6 + $0x354] sm:$0xf0]  ;;  %v4896_v48 = vld [vmem:[#allocation6 + $0x36c] sm:$0xf]  ;;  %v4368_v51 = vld [vmem:[#allocation6 + $0x378] sm:$0xf0] }
 0x155   :  { %2676 = vmatpush.bf16.msra.mxu3 %v3955_v17  ;;  %2690 = vmatpush.bf16.msra.mxu1 %v4083_v61  ;;  %v4870_v17 = vld [vmem:[#allocation6 + $0x294] sm:$0xf0] }
 0x156   :  { %v1651_v63 = vpop.f32.mrf.mxu2  ;;  %v1667_v28 = vpop.f32.mrf.mxu0 }
 0x157   :  { %v1637_v33 = vpop.f32.mrf.mxu3 }
 0x158   :  { %v1638_v36 = vadd.f32 %v1637_v33, %v1624_v3  ;;  %v4906_v3 = vld [vmem:[#allocation6 + $0x3b4] sm:$0xf0]  ;;  %v4254_v33 = vld [vmem:[#allocation6 + $0x288] sm:$0xf] }
 0x159   :  { %2677 = vmatpush.bf16.msra.mxu3 %v3939_v7  ;;  %2691 = vmatpush.bf16.msra.mxu1 %v4067_v9  ;;  %v4399_v56 = vor.u32 %v4906_v3, %v4398_v59  ;;  %v4350_v7 = vld [vmem:[#allocation6 + $0x348] sm:$0xf]  ;;  %v4371_v3 = vor.u32 %v4896_v48, %v4368_v51 }
 0x15a   :  { %v1652_v53 = vadd.f32 %v1651_v63, %v1638_v36  ;;  %v4902_v36 = vld [vmem:[#allocation6 + $0x394] sm:$0xf0]  ;;  %v4255_v63 = vor.u32 %v4870_v17, %v4254_v33  ;;  %v4351_v9 = vor.u32 %v4894_v24, %v4350_v7  ;;  %v4892_v33 = vld [vmem:[#allocation6 + $0x34c] sm:$0xf]  ;;  %v4352_v17 = vld [vmem:[#allocation6 + $0x358] sm:$0xf0] }
 0x15b   :  { %v1679_v60 = vpop.f32.mrf.mxu1  ;;  %v4383_v61 = vor.u32 %v4902_v36, %v4382_v62  ;;  %v4355_v36 = vor.u32 %v4892_v33, %v4352_v17  ;;  %v4942_v17 = vld [vmem:[%s5395_s5 + $0xb8] sm:$0xff] }
 0x15c   :  { %v1666_v58 = vadd.f32 %v1665_v4, %v1652_v53  ;;  %2678 = vmatmul.bf16.vlgmr.msra.gmra.mxu3 %v5202_v55  ;;  %2692 = vmatmul.bf16.vlgmr.msra.gmra.mxu1 %v5204_v26  ;;  %v4303_v26 = vor.u32 %v4882_v54, %v4302_v22  ;;  %v4239_v4 = vor.u32 %v4866_v0, %v4238_v43  ;;  %v4862_v53 = vld [vmem:[#allocation6 + $0x254] sm:$0xf0]  ;;  %v4888_v43 = vld [vmem:[#allocation6 + $0x32c] sm:$0xf]  ;;  %v4336_v0 = vld [vmem:[#allocation6 + $0x338] sm:$0xf0] }
 0x15d   :  { %v4339_v2 = vor.u32 %v4888_v43, %v4336_v0 }
 0x15e   :  { %v1680_v14 = vadd.f32 %v1679_v60, %v1666_v58  ;;  %v1653_v23 = vpop.f32.mrf.mxu2  ;;  %v4223_v58 = vor.u32 %v4862_v53, %v4222_v6  ;;  %v4890_v60 = vld [vmem:[#allocation6 + $0x334] sm:$0xf0]  ;;  %v4884_v6 = vld [vmem:[#allocation6 + $0x30c] sm:$0xf]  ;;  %v4320_v53 = vld [vmem:[#allocation6 + $0x318] sm:$0xf0] }
 0x15f   :  { %v1639_v16 = vpop.f32.mrf.mxu3  ;;  %v4323_v24 = vor.u32 %v4884_v6, %v4320_v53  ;;  %v4940_v53 = vld [vmem:[%s5395_s5 + $0xa8] sm:$0xff] }
 0x160   :  { %v1640_v46 = vadd.f32 %v1639_v16, %v1626_v12  ;;  %v1687_v21 = vmax.f32 %v1680_v14, 0.0  ;;  %v4334_v12 = vld [vmem:[#allocation6 + $0x328] sm:$0xf] }
 0x161   :  { %v4335_v14 = vor.u32 %v4890_v60, %v4334_v12  ;;  %v4190_v16 = vld [vmem:[#allocation6 + $0x208] sm:$0xf]  ;;  %v4923_v60 = vld [vmem:[%s5395_s5 + $0x20] sm:$0xff] }
 0x162   :  { %v1654_v27 = vadd.f32 %v1653_v23, %v1640_v46  ;;  %v1693_v29 = vpack.c.bf16 %v1687_v21, %v1686_v19  ;;  %v4854_v46 = vld [vmem:[#allocation6 + $0x214] sm:$0xf0]  ;;  %v4318_v19 = vld [vmem:[#allocation6 + $0x308] sm:$0xf]  ;;  %v4880_v21 = vld [vmem:[#allocation6 + $0x2ec] sm:$0xf] }
 0x163   :  { %v1681_v34 = vpop.f32.mrf.mxu1  ;;  %v4304_v23 = vld [vmem:[#allocation6 + $0x2f8] sm:$0xf0]  ;;  %v4932_v12 = vld [vmem:[%s5395_s5 + $0x68] sm:$0xff] }
 0x164   :  { %v1668_v50 = vadd.f32 %v1667_v28, %v1654_v27  ;;  %1697 = vst [vmem:[#allocation2 + $0x8] sm:$0xff] %v1693_v29  ;;  %v4912_v27 = vld [vmem:[#allocation6 + $0x3ec] sm:$0xf]  ;;  %v4432_v28 = vld [vmem:[#allocation6 + $0x3f8] sm:$0xf0]  ;;  %v4191_v29 = vor.u32 %v4854_v46, %v4190_v16  ;;  %v4307_v1 = vor.u32 %v4880_v21, %v4304_v23  ;;  %v4921_v21 = vld [vmem:[%s5395_s5 + $0x10] sm:$0xff] }
 0x165   :  { %v4922_v46 = vld [vmem:[%s5395_s5 + $0x18] sm:$0xff]  ;;  %v4929_v23 = vld [vmem:[%s5395_s5 + $0x50] sm:$0xff] }
 0x166   :  { %v1682_v30 = vadd.f32 %v1681_v34, %v1668_v50  ;;  %v4319_v50 = vor.u32 %v4886_v57, %v4318_v19  ;;  %v4435_v34 = vor.u32 %v4912_v27, %v4432_v28  ;;  %v4930_v19 = vld [vmem:[%s5395_s5 + $0x58] sm:$0xff]  ;;  %v5318_v27 = vld [vmem:[%s5394_s4] sm:$0xf] }
 0x168   :  { %v1691_v32 = vmax.f32 %v1682_v30, 0.0  ;;  %v4876_v30 = vld [vmem:[#allocation6 + $0x2cc] sm:$0xf] }
 0x16a   :  { %v1695_v8 = vpack.c.bf16 %v1691_v32, %v1690_v31  ;;  %v4288_v31 = vld [vmem:[#allocation6 + $0x2d8] sm:$0xf0]  ;;  %v4908_v32 = vld [vmem:[#allocation6 + $0x3cc] sm:$0xf] }
 0x16b   :  { %v3918_v5 = vld [vmem:[#allocation2 + $0x8] sm:$0xf]  ;;  %v4784_v55 = vld [vmem:[#allocation2 + $0xc] sm:$0xf]  ;;  %v4291_v22 = vor.u32 %v4876_v30, %v4288_v31 }
 0x16c   :  { %1699 = vst [vmem:[#allocation2 + $0x18] sm:$0xff] %v1695_v8  ;;  %v4416_v8 = vld [vmem:[#allocation6 + $0x3d8] sm:$0xf0] }
 0x16d   :  { %v4419_v54 = vor.u32 %v4908_v32, %v4416_v8  ;;  %v1835_v8 = vperm.slane %v5318_v27, 1 }
 0x173   :  { %v4786_v39 = vld [vmem:[#allocation2 + $0x14] sm:$0xf0]  ;;  %v3920_v41 = vld [vmem:[#allocation2 + $0x18] sm:$0xf0] }
 0x174   :  { %v5267_v42 = vor.u32 %v4786_v39, %v3918_v5  ;;  %v5269_v45 = vor.u32 %v4784_v55, %v3920_v41  ;;  %v4904_v5 = vld [vmem:[#allocation6 + $0x3ac] sm:$0xf]  ;;  %v4275_v39 = vor.u32 %v4872_v13, %v4272_v35 }
 0x175   :  { %v4403_v55 = vor.u32 %v4904_v5, %v4400_v38  ;;  %v4868_v41 = vld [vmem:[#allocation6 + $0x28c] sm:$0xf] }
 0x176   :  { %2538 = vmatmul.bf16.vlgmr.msrb.gmra.mxu2 %v5267_v42  ;;  %2552 = vmatmul.bf16.vlgmr.msrb.gmra.mxu0 %v5269_v45 }
 0x177   :  { %2642 = vmatpush.bf16.msrb.mxu2 %v4303_v26  ;;  %2656 = vmatpush.bf16.msrb.mxu0 %v4431_v37  ;;  %v4256_v26 = vld [vmem:[#allocation6 + $0x298] sm:$0xf0]  ;;  %v4900_v37 = vld [vmem:[#allocation6 + $0x38c] sm:$0xf] }
 0x178   :  { %v4259_v25 = vor.u32 %v4868_v41, %v4256_v26  ;;  %v4387_v18 = vor.u32 %v4900_v37, %v4384_v44 }
 0x17b   :  { %2643 = vmatpush.bf16.msrb.mxu2 %v4287_v20  ;;  %2657 = vmatpush.bf16.msrb.mxu0 %v4415_v47  ;;  %v4864_v20 = vld [vmem:[#allocation6 + $0x26c] sm:$0xf]  ;;  %v4240_v47 = vld [vmem:[#allocation6 + $0x278] sm:$0xf0] }
 0x17c   :  { %v4243_v59 = vor.u32 %v4864_v20, %v4240_v47 }
 0x17f   :  { %2644 = vmatpush.bf16.msrb.mxu2 %v4271_v52  ;;  %2658 = vmatpush.bf16.msrb.mxu0 %v4399_v56  ;;  %v4860_v52 = vld [vmem:[#allocation6 + $0x24c] sm:$0xf]  ;;  %v4224_v56 = vld [vmem:[#allocation6 + $0x258] sm:$0xf0] }
 0x180   :  { %v4227_v62 = vor.u32 %v4860_v52, %v4224_v56 }
 0x183   :  { %2645 = vmatpush.bf16.msrb.mxu2 %v4255_v63  ;;  %2659 = vmatpush.bf16.msrb.mxu0 %v4383_v61  ;;  %v4856_v63 = vld [vmem:[#allocation6 + $0x22c] sm:$0xf]  ;;  %v4208_v61 = vld [vmem:[#allocation6 + $0x238] sm:$0xf0] }
 0x184   :  { %v4211_v49 = vor.u32 %v4856_v63, %v4208_v61 }
 0x186   :  { %2594 = vmatmul.bf16.vlgmr.msra.gmra.mxu2 %v5267_v42  ;;  %2608 = vmatmul.bf16.vlgmr.msra.gmra.mxu0 %v5269_v45 }
 0x187   :  { %2646 = vmatpush.bf16.msrb.mxu2 %v4239_v4  ;;  %2660 = vmatpush.bf16.msrb.mxu0 %v4367_v15  ;;  %v4852_v4 = vld [vmem:[#allocation6 + $0x20c] sm:$0xf]  ;;  %v4192_v15 = vld [vmem:[#allocation6 + $0x218] sm:$0xf0] }
 0x188   :  { %v4195_v7 = vor.u32 %v4852_v4, %v4192_v15 }
 0x18b   :  { %2647 = vmatpush.bf16.msrb.mxu2 %v4223_v58  ;;  %2661 = vmatpush.bf16.msrb.mxu0 %v4351_v9  ;;  %v4926_v58 = vld [vmem:[%s5395_s5 + $0x38] sm:$0xff] }
 0x18c   :  { %v4934_v9 = vld [vmem:[%s5395_s5 + $0x78] sm:$0xff]  ;;  %3026 = vmatpush.bf16.msrb.mxu3 %v4926_v58  ;;  %v4939_v58 = vld [vmem:[%s5395_s5 + $0xa0] sm:$0xff] }
 0x18d   :  { %3040 = vmatpush.bf16.msrb.mxu1 %v4934_v9  ;;  %v4947_v9 = vld [vmem:[%s5395_s5 + $0xe0] sm:$0xff] }
 0x18f   :  { %2648 = vmatpush.bf16.msrb.mxu2 %v4207_v40  ;;  %2662 = vmatpush.bf16.msrb.mxu0 %v4335_v14  ;;  %v4931_v40 = vld [vmem:[%s5395_s5 + $0x60] sm:$0xff] }
 0x190   :  { %3027 = vmatpush.bf16.msrb.mxu3 %v4925_v10 }
 0x193   :  { %2649 = vmatpush.bf16.msrb.mxu2 %v4191_v29  ;;  %2663 = vmatpush.bf16.msrb.mxu0 %v4319_v50  ;;  %v1834_v50 = vperm.slane %v5318_v27, 0 }
 0x196   :  { %2650 = vmatmul.bf16.vlgmr.msrb.gmra.mxu2 %v5267_v42  ;;  %2664 = vmatmul.bf16.vlgmr.msrb.gmra.mxu0 %v5269_v45 }
 0x197   :  { %2698 = vmatpush.bf16.msra.mxu2 %v4307_v1  ;;  %2712 = vmatpush.bf16.msra.mxu0 %v4435_v34  ;;  %v4920_v1 = vld [vmem:[%s5395_s5 + $0x8] sm:$0xff] }
 0x198   :  { %v4928_v34 = vld [vmem:[%s5395_s5 + $0x48] sm:$0xff] }
 0x199   :  { %v2525_v14 = vpop.f32.mrf.mxu1 }
 0x19b   :  { %2699 = vmatpush.bf16.msra.mxu2 %v4291_v22  ;;  %2713 = vmatpush.bf16.msra.mxu0 %v4419_v54  ;;  %v4919_v22 = vld [vmem:[%s5395_s5] sm:$0xff] }
 0x19c   :  { %v4927_v54 = vld [vmem:[%s5395_s5 + $0x40] sm:$0xff] }
 0x19f   :  { %2700 = vmatpush.bf16.msra.mxu2 %v4275_v39  ;;  %2714 = vmatpush.bf16.msra.mxu0 %v4403_v55  ;;  %v2511_v11 = vpop.f32.mrf.mxu3 }
 0x1a0   :  { %v2512_v32 = vadd.f32 %v2511_v11, %v1834_v50  ;;  %v4938_v11 = vld [vmem:[%s5395_s5 + $0x98] sm:$0xff] }
 0x1a1   :  { %v2527_v29 = vpop.f32.mrf.mxu1 }
 0x1a2   :  { %v2526_v5 = vadd.f32 %v2525_v14, %v2512_v32 }
 0x1a3   :  { %2701 = vmatpush.bf16.msra.mxu2 %v4259_v25  ;;  %2715 = vmatpush.bf16.msra.mxu0 %v4387_v18 }
 0x1a7   :  { %2702 = vmatpush.bf16.msra.mxu2 %v4243_v59  ;;  %2716 = vmatpush.bf16.msra.mxu0 %v4371_v3  ;;  %v2513_v16 = vpop.f32.mrf.mxu3 }
 0x1a8   :  { %v2514_v55 = vadd.f32 %v2513_v16, %v1834_v50  ;;  %v1836_v50 = vperm.slane %v5318_v27, 2 }
 0x1a9   :  { %v2581_v38 = vpop.f32.mrf.mxu1 }
 0x1aa   :  { %v2528_v47 = vadd.f32 %v2527_v29, %v2514_v55  ;;  %v4944_v29 = vld [vmem:[%s5395_s5 + $0xc8] sm:$0xff] }
 0x1ab   :  { %2703 = vmatpush.bf16.msra.mxu2 %v4227_v62  ;;  %2717 = vmatpush.bf16.msra.mxu0 %v4355_v36  ;;  %v4950_v62 = vld [vmem:[%s5395_s5 + $0xf8] sm:$0xff] }
 0x1af   :  { %2704 = vmatpush.bf16.msra.mxu2 %v4211_v49  ;;  %2718 = vmatpush.bf16.msra.mxu0 %v4339_v2  ;;  %v2567_v30 = vpop.f32.mrf.mxu3  ;;  %v4941_v49 = vld [vmem:[%s5395_s5 + $0xb0] sm:$0xff] }
 0x1b0   :  { %v2568_v35 = vadd.f32 %v2567_v30, %v1835_v8  ;;  %v4949_v2 = vld [vmem:[%s5395_s5 + $0xf0] sm:$0xff]  ;;  %v4943_v30 = vld [vmem:[%s5395_s5 + $0xc0] sm:$0xff] }
 0x1b1   :  { %v2583_v52 = vpop.f32.mrf.mxu1 }
 0x1b2   :  { %v2582_v26 = vadd.f32 %v2581_v38, %v2568_v35 }
 0x1b3   :  { %2705 = vmatpush.bf16.msra.mxu2 %v4195_v7  ;;  %2719 = vmatpush.bf16.msra.mxu0 %v4323_v24  ;;  %v4948_v7 = vld [vmem:[%s5395_s5 + $0xe8] sm:$0xff] }
 0x1b6   :  { %2706 = vmatmul.bf16.vlgmr.msra.gmra.mxu2 %v5267_v42  ;;  %2720 = vmatmul.bf16.vlgmr.msra.gmra.mxu0 %v5269_v45  ;;  %v4933_v42 = vld [vmem:[%s5395_s5 + $0x70] sm:$0xff]  ;;  %v4924_v45 = vld [vmem:[%s5395_s5 + $0x28] sm:$0xff] }
 0x1b7   :  { %3041 = vmatpush.bf16.msrb.mxu1 %v4933_v42  ;;  %3028 = vmatpush.bf16.msrb.mxu3 %v4924_v45  ;;  %v2569_v41 = vpop.f32.mrf.mxu3  ;;  %v4946_v45 = vld [vmem:[%s5395_s5 + $0xd8] sm:$0xff] }
 0x1b8   :  { %v2570_v20 = vadd.f32 %v2569_v41, %v1835_v8  ;;  %3054 = vmatpush.bf16.msrb.mxu2 %v4942_v17  ;;  %3068 = vmatpush.bf16.msrb.mxu0 %v4950_v62  ;;  %v1837_v8 = vperm.slane %v5318_v27, 3 }
 0x1b9   :  { %v2637_v10 = vpop.f32.mrf.mxu1 }
 0x1ba   :  { %v2584_v33 = vadd.f32 %v2583_v52, %v2570_v20 }
 0x1bb   :  { %3042 = vmatpush.bf16.msrb.mxu1 %v4932_v12  ;;  %3029 = vmatpush.bf16.msrb.mxu3 %v4923_v60 }
 0x1bc   :  { %3055 = vmatpush.bf16.msrb.mxu2 %v4941_v49  ;;  %3069 = vmatpush.bf16.msrb.mxu0 %v4949_v2 }
 0x1bf   :  { %3043 = vmatpush.bf16.msrb.mxu1 %v4931_v40  ;;  %3030 = vmatpush.bf16.msrb.mxu3 %v4922_v46  ;;  %v2623_v24 = vpop.f32.mrf.mxu3 }
 0x1c0   :  { %3056 = vmatpush.bf16.msrb.mxu2 %v4940_v53  ;;  %3070 = vmatpush.bf16.msrb.mxu0 %v4948_v7  ;;  %v2624_v32 = vadd.f32 %v2623_v24, %v1836_v50  ;;  %v4960_v24 = vld [vmem:[%s5396_s6] ss:$0 sm:$0xff] }
 0x1c2   :  { %v2638_v35 = vadd.f32 %v2637_v10, %v2624_v32 }
 0x1c3   :  { %3044 = vmatpush.bf16.msrb.mxu1 %v4930_v19  ;;  %3031 = vmatpush.bf16.msrb.mxu3 %v4921_v21  ;;  %v4937_v21 = vld [vmem:[%s5395_s5 + $0x90] sm:$0xff] }
 0x1c4   :  { %3057 = vmatpush.bf16.msrb.mxu2 %v4939_v58  ;;  %3071 = vmatpush.bf16.msrb.mxu0 %v4947_v9 }
 0x1c7   :  { %3045 = vmatpush.bf16.msrb.mxu1 %v4929_v23  ;;  %3032 = vmatpush.bf16.msrb.mxu3 %v4920_v1  ;;  %v2625_v46 = vpop.f32.mrf.mxu3  ;;  %v4945_v23 = vld [vmem:[%s5395_s5 + $0xd0] sm:$0xff]  ;;  %v2639_v1 = vpop.f32.mrf.mxu1 }
 0x1c8   :  { %3058 = vmatpush.bf16.msrb.mxu2 %v4938_v11  ;;  %3072 = vmatpush.bf16.msrb.mxu0 %v4946_v45 }
 0x1cb   :  { %3046 = vmatpush.bf16.msrb.mxu1 %v4928_v34  ;;  %3033 = vmatpush.bf16.msrb.mxu3 %v4919_v22  ;;  %v4935_v34 = vld [vmem:[%s5395_s5 + $0x80] sm:$0xff] }
 0x1cc   :  { %3059 = vmatpush.bf16.msrb.mxu2 %v4937_v21  ;;  %3073 = vmatpush.bf16.msrb.mxu0 %v4945_v23 }
 0x1cf   :  { %3047 = vmatpush.bf16.msrb.mxu1 %v4927_v54 }
 0x1d0   :  { %3074 = vmatpush.bf16.msrb.mxu0 %v4944_v29 }
 0x1d4   :  { %3075 = vmatpush.bf16.msrb.mxu0 %v4943_v30 }
 0x1f3   :  { %v2553_v57 = vpop.f32.mrf.mxu0 }
 0x1f9   :  { %v2539_v28 = vpop.f32.mrf.mxu2 }
 0x1fa   :  { %v2540_v39 = vadd.f32 %v2539_v28, %v2526_v5  ;;  %v4936_v28 = vld [vmem:[%s5395_s5 + $0x88] sm:$0xff]  ;;  %v2693_v5 = vpop.f32.mrf.mxu1 }
 0x1fb   :  { %v2555_v31 = vpop.f32.mrf.mxu0  ;;  %3060 = vmatpush.bf16.msrb.mxu2 %v4936_v28 }
 0x1fc   :  { %v2554_v25 = vadd.f32 %v2553_v57, %v2540_v39  ;;  %v2626_v39 = vadd.f32 %v2625_v46, %v1836_v50 }
 0x1fe   :  { %v2726_v51 = vmax.f32 %v2554_v25, 0.0  ;;  %v2640_v20 = vadd.f32 %v2639_v1, %v2626_v39 }
 0x1ff   :  { %3061 = vmatpush.bf16.msrb.mxu2 %v4935_v34 }
 0x201   :  { %v2541_v13 = vpop.f32.mrf.mxu2 }
 0x202   :  { %v2542_v59 = vadd.f32 %v2541_v13, %v2528_v47 }
 0x203   :  { %v2609_v37 = vpop.f32.mrf.mxu0 }
 0x204   :  { %v2556_v63 = vadd.f32 %v2555_v31, %v2542_v59  ;;  %v2679_v31 = vpop.f32.mrf.mxu3  ;;  %v2695_v59 = vpop.f32.mrf.mxu1 }
 0x205   :  { %v2680_v13 = vadd.f32 %v2679_v31, %v1837_v8 }
 0x206   :  { %v2730_v4 = vmax.f32 %v2556_v63, 0.0 }
 0x207   :  { %v2694_v41 = vadd.f32 %v2693_v5, %v2680_v13 }
 0x209   :  { %v2595_v44 = vpop.f32.mrf.mxu2 }
 0x20a   :  { %v2596_v18 = vadd.f32 %v2595_v44, %v2582_v26 }
 0x20b   :  { %v2611_v43 = vpop.f32.mrf.mxu0 }
 0x20c   :  { %v2610_v48 = vadd.f32 %v2609_v37, %v2596_v18  ;;  %v2681_v55 = vpop.f32.mrf.mxu3 }
 0x20d   :  { %v2682_v18 = vadd.f32 %v2681_v55, %v1837_v8 }
 0x20e   :  { %v2727_v3 = vmax.f32 %v2610_v48, 0.0 }
 0x20f   :  { %v2696_v52 = vadd.f32 %v2695_v59, %v2682_v18 }
 0x210   :  { %v2734_v56 = vpack.c.bf16 %v2727_v3, %v2726_v51 }
 0x211   :  { %v2597_v36 = vpop.f32.mrf.mxu2 }
 0x212   :  { %2738 = vst [vmem:[#allocation3] sm:$0xff] %v2734_v56  ;;  %v2598_v61 = vadd.f32 %v2597_v36, %v2584_v33 }
 0x213   :  { %v2665_v19 = vpop.f32.mrf.mxu0 }
 0x214   :  { %v2612_v0 = vadd.f32 %v2611_v43, %v2598_v61 }
 0x216   :  { %v2731_v15 = vmax.f32 %v2612_v0, 0.0 }
 0x218   :  { %v2736_v6 = vpack.c.bf16 %v2731_v15, %v2730_v4 }
 0x219   :  { %v4438_v42 = vld [vmem:[#allocation3] sm:$0xf]  ;;  %v4915_v60 = vld [vmem:[#allocation3 + $0x4] sm:$0xf]  ;;  %v2651_v57 = vpop.f32.mrf.mxu2 }
 0x21a   :  { %2740 = vst [vmem:[#allocation3 + $0x10] sm:$0xff] %v2736_v6  ;;  %v2652_v38 = vadd.f32 %v2651_v57, %v2638_v35 }
 0x21b   :  { %v2667_v22 = vpop.f32.mrf.mxu0 }
 0x21c   :  { %v2666_v44 = vadd.f32 %v2665_v19, %v2652_v38 }
 0x21e   :  { %v2728_v48 = vmax.f32 %v2666_v44, 0.0 }
 0x221   :  { %v4917_v12 = vld [vmem:[#allocation3 + $0xc] sm:$0xf0]  ;;  %v4440_v40 = vld [vmem:[#allocation3 + $0x10] sm:$0xf0]  ;;  %v2653_v54 = vpop.f32.mrf.mxu2 }
 0x222   :  { %v4439_v14 = vor.u32 %v4917_v12, %v4438_v42  ;;  %v4443_v16 = vor.u32 %v4915_v60, %v4440_v40  ;;  %v2654_v27 = vadd.f32 %v2653_v54, %v2640_v20 }
 0x224   :  { %3034 = vmatmul.bf16.vlgmr.msrb.gmra.mxu3 %v4439_v14  ;;  %3048 = vmatmul.bf16.vlgmr.msrb.gmra.mxu1 %v4443_v16  ;;  %v2668_v33 = vadd.f32 %v2667_v22, %v2654_v27 }
 0x226   :  { %v2732_v63 = vmax.f32 %v2668_v33, 0.0 }
 0x233   :  { %v2721_v26 = vpop.f32.mrf.mxu0 }
 0x239   :  { %v2707_v37 = vpop.f32.mrf.mxu2 }
 0x23a   :  { %v2708_v25 = vadd.f32 %v2707_v37, %v2694_v41 }
 0x23b   :  { %v2723_v62 = vpop.f32.mrf.mxu0 }
 0x23c   :  { %v2722_v47 = vadd.f32 %v2721_v26, %v2708_v25 }
 0x23e   :  { %v2729_v51 = vmax.f32 %v2722_v47, 0.0 }
 0x240   :  { %v2735_v3 = vpack.c.bf16 %v2729_v51, %v2728_v48 }
 0x241   :  { %v2709_v56 = vpop.f32.mrf.mxu2 }
 0x242   :  { %2739 = vst [vmem:[#allocation3 + $0x8] sm:$0xff] %v2735_v3  ;;  %v2710_v17 = vadd.f32 %v2709_v56, %v2696_v52 }
 0x244   :  { %v2724_v36 = vadd.f32 %v2723_v62, %v2710_v17 }
 0x246   :  { %v2733_v61 = vmax.f32 %v2724_v36, 0.0 }
 0x248   :  { %v2737_v43 = vpack.c.bf16 %v2733_v61, %v2732_v63 }
 0x249   :  { %v4446_v0 = vld [vmem:[#allocation3 + $0x8] sm:$0xf]  ;;  %v4916_v2 = vld [vmem:[#allocation3 + $0xc] sm:$0xf] }
 0x24a   :  { %2741 = vst [vmem:[#allocation3 + $0x18] sm:$0xff] %v2737_v43 }
 0x251   :  { %v4918_v49 = vld [vmem:[#allocation3 + $0x14] sm:$0xf0]  ;;  %v4448_v4 = vld [vmem:[#allocation3 + $0x18] sm:$0xf0] }
 0x252   :  { %v4447_v15 = vor.u32 %v4918_v49, %v4446_v0  ;;  %v4451_v6 = vor.u32 %v4916_v2, %v4448_v4 }
 0x254   :  { %3062 = vmatmul.bf16.vlgmr.msrb.gmra.mxu2 %v4447_v15  ;;  %3076 = vmatmul.bf16.vlgmr.msrb.gmra.mxu0 %v4451_v6 }
 0x2a1   :  { %v3049_v7 = vpop.f32.mrf.mxu1 }
 0x2a7   :  { %v3035_v53 = vpop.f32.mrf.mxu3 }
 0x2a8   :  { %v3036_v42 = vadd.f32 %v4960_v24, %v3035_v53 }
 0x2a9   :  { %v3051_v12 = vpop.f32.mrf.mxu1 }
 0x2aa   :  { %v3050_v45 = vadd.f32 %v3049_v7, %v3036_v42 }
 0x2af   :  { %v3037_v58 = vpop.f32.mrf.mxu3 }
 0x2b0   :  { %v3038_v11 = vadd.f32 %v4960_v24, %v3037_v58 }
 0x2b2   :  { %v3052_v40 = vadd.f32 %v3051_v12, %v3038_v11 }
 0x2d1   :  { %v3077_v9 = vpop.f32.mrf.mxu0 }
 0x2d7   :  { %v3063_v10 = vpop.f32.mrf.mxu2 }
 0x2d8   :  { %v3064_v60 = vadd.f32 %v3063_v10, %v3050_v45 }
 0x2d9   :  { %v3079_v46 = vpop.f32.mrf.mxu0 }
 0x2da   :  { %v3078_v19 = vadd.f32 %v3077_v9, %v3064_v60 }
 0x2df   :  { %v3065_v14 = vpop.f32.mrf.mxu2 }
 0x2e0   :  { %v3066_v16 = vadd.f32 %v3065_v14, %v3052_v40 }
 0x2e2   :  { %v3080_v57 = vadd.f32 %v3079_v46, %v3066_v16 }
 0x2e4   :  { %v4954_v21 = vpack.c.bf16 %v3080_v57, %v3078_v19 }
 0x2e6   :  { %4955 = vst [vmem:[%s5397_s7] sm:$0xff] %v4954_v21  }
 0x2e7   :  { %3090 = vsyncpa [#allocation5], 1 }
 0x2e8   :  { %3091 = vsyncpa [#allocation7], 1 }

</bundles_post_ra>
